<compile_context>
chip_gen: v6e
topology: v6e:2x2x1
jax: 0.10.0
libtpu: 0.0.40
codegen_flags: <defaults>
</compile_context>

<pallas_src>
import math

import jax
import jax.numpy as jnp
from jax.experimental import pallas as pl
from jax.experimental.pallas import tpu as pltpu

BN_EPS = 1e-5

# Static geometry implied by the module (fc1 expects 16*6*6 -> 32x32x3 input).
H0 = W0 = 32
C0, C1, C2 = 3, 8, 16
K = 3
OH1 = OW1 = H0 - K + 1            # 30
PH1 = PW1 = OH1 // 2              # 15
OH2 = OW2 = PH1 - K + 1           # 13
PH2 = PW2 = OH2 // 2              # 6
FC1_OUT, FC2_OUT = 32, 10


# ---------------------------------------------------------------------------
# Fused whole-network Pallas kernel (one image per grid step)
# ---------------------------------------------------------------------------
def _net_kernel(x_ref, t1_ref, post1_ref, sh1_ref, sw1_ref,
                t2_ref, post2_ref, sh2_ref, sw2_ref,
                fc1w_ref, fc1b_ref, fc2w_ref, fc2b_ref, out_ref):
    f32 = jnp.float32
    x = x_ref[0]                                             # [32, 96]  (h, w*3+ci)

    # ---- conv1: 3 banded matmuls over the kernel-row index ----------------
    acc1 = jnp.dot(x[0:OH1, :], t1_ref[0], preferred_element_type=f32)
    for kh in range(1, K):
        acc1 = acc1 + jnp.dot(x[kh:kh + OH1, :], t1_ref[kh],
                              preferred_element_type=f32)    # [30, 240] (oh, ow*8+co)
    y1 = jnp.maximum(acc1 + post1_ref[0:1, :], 0.0)          # + bias, ReLU
    y1 = y1 * post1_ref[1:2, :] + post1_ref[2:3, :]          # BN affine (eval mode)

    # ---- maxpool 2x2 / stride 2 (fused, in-register) -----------------------
    mh = jnp.maximum(y1[0:OH1 - 1, :], y1[1:OH1, :])         # row-pair max
    mw = jnp.maximum(mh[:, 0:(OW1 - 1) * C1], mh[:, C1:OW1 * C1])   # col-pair max
    p1 = jnp.dot(sh1_ref[...],
                 jnp.dot(mw, sw1_ref[...], preferred_element_type=f32),
                 preferred_element_type=f32)                 # [15, 120] (h, w*8+c)

    # ---- conv2 (same banded-matmul trick) ----------------------------------
    acc2 = jnp.dot(p1[0:OH2, :], t2_ref[0], preferred_element_type=f32)
    for kh in range(1, K):
        acc2 = acc2 + jnp.dot(p1[kh:kh + OH2, :], t2_ref[kh],
                              preferred_element_type=f32)    # [13, 208] (oh, ow*16+co)
    y2 = jnp.maximum(acc2 + post2_ref[0:1, :], 0.0)
    y2 = y2 * post2_ref[1:2, :] + post2_ref[2:3, :]

    mh2 = jnp.maximum(y2[0:OH2 - 1, :], y2[1:OH2, :])
    mw2 = jnp.maximum(mh2[:, 0:(OW2 - 1) * C2], mh2[:, C2:OW2 * C2])
    p2 = jnp.dot(sh2_ref[...],
                 jnp.dot(mw2, sw2_ref[...], preferred_element_type=f32),
                 preferred_element_type=f32)                 # [6, 96] (h, w*16+c)

    # ---- fc1 (+bias, ReLU) accumulated over the 6 pooled rows, then fc2 ----
    h1 = fc1b_ref[...]                                       # [1, 32]
    for h in range(PH2):
        h1 = h1 + jnp.dot(p2[h:h + 1, :], fc1w_ref[h], preferred_element_type=f32)
    h1 = jnp.maximum(h1, 0.0)
    out_ref[0] = (jnp.dot(h1, fc2w_ref[...], preferred_element_type=f32)
                  + fc2b_ref[...])                           # [1, 10]


# ---------------------------------------------------------------------------
# Wrapper-side operand preparation (pure JAX, done once per parameter set)
# ---------------------------------------------------------------------------
def _band_matrix(w, w_in):
    """Conv weight [Cout,Cin,KH,KW] -> banded matrices T[KH, W_in*Cin, OW*Cout]
    with T[kh, w*Cin+ci, ow*Cout+co] = w[co,ci,kh, w-ow] when 0 <= w-ow < KW."""
    cout, cin, kh, kw = w.shape
    ow = w_in - kw + 1
    dif = jnp.arange(w_in)[:, None] - jnp.arange(ow)[None, :]        # [W_in, OW]
    valid = (dif >= 0) & (dif < kw)
    gath = w.astype(jnp.float32)[:, :, :, jnp.clip(dif, 0, kw - 1)]  # [o,i,y,W_in,OW]
    t = jnp.where(valid[None, None, None], gath, 0.0)
    t = t.transpose(2, 3, 1, 4, 0)                                   # [y, W_in, i, OW, o]
    return t.reshape(kh, w_in * cin, ow * cout)


def _pool_row_select(oh):
    ph = oh // 2
    return (jnp.arange(oh - 1)[None, :] == 2 * jnp.arange(ph)[:, None]).astype(jnp.float32)


def _pool_col_select(ow, c):
    pw = ow // 2
    r = jnp.arange((ow - 1) * c)
    s = jnp.arange(pw * c)
    return (((r[:, None] // c) == 2 * (s[None, :] // c))
            & ((r[:, None] % c) == (s[None, :] % c))).astype(jnp.float32)


def _build_operands(params):
    scale1 = params["bn1_gamma"] / jnp.sqrt(params["bn1_var"] + BN_EPS)
    shift1 = params["bn1_beta"] - params["bn1_mean"] * scale1
    scale2 = params["bn2_gamma"] / jnp.sqrt(params["bn2_var"] + BN_EPS)
    shift2 = params["bn2_beta"] - params["bn2_mean"] * scale2

    t1 = _band_matrix(params["conv1_w"], H0)                       # [3, 96, 240]
    t2 = _band_matrix(params["conv2_w"], PH1)                      # [3, 120, 208]
    post1 = jnp.stack([jnp.tile(params["conv1_b"], OW1),
                       jnp.tile(scale1, OW1),
                       jnp.tile(shift1, OW1)]).astype(jnp.float32)  # [3, 240]
    post2 = jnp.stack([jnp.tile(params["conv2_b"], OW2),
                       jnp.tile(scale2, OW2),
                       jnp.tile(shift2, OW2)]).astype(jnp.float32)  # [3, 208]
    sh1, sw1 = _pool_row_select(OH1), _pool_col_select(OW1, C1)     # [15,29],[232,120]
    sh2, sw2 = _pool_row_select(OH2), _pool_col_select(OW2, C2)     # [6,12],[192,96]

    # fc1 weight permuted from PyTorch flatten order (c,h,w) to kernel layout (h, w*C2+c)
    fc1w = params["fc1_w"].reshape(FC1_OUT, C2, PH2, PW2)
    fc1w = fc1w.transpose(2, 3, 1, 0).reshape(PH2, PW2 * C2, FC1_OUT)   # [6, 96, 32]
    fc1b = params["fc1_b"].reshape(1, FC1_OUT).astype(jnp.float32)
    fc2w = params["fc2_w"].T.astype(jnp.float32)                        # [32, 10]
    fc2b = params["fc2_b"].reshape(1, FC2_OUT).astype(jnp.float32)
    return (t1, post1, sh1, sw1, t2, post2, sh2, sw2, fc1w, fc1b, fc2w, fc2b)


def _net_forward(params, x):
    """x: [B, 3, 32, 32] NCHW float32 -> logits [B, 10]."""
    B = x.shape[0]
    # NCHW -> lane-dense per-image slabs [B, 32, 96] with layout (h, w*3 + ci)
    x_rows = x.astype(jnp.float32).transpose(0, 2, 3, 1).reshape(B, H0, W0 * C0)
    ops = _build_operands(params)

    def resident(shape):
        return pl.BlockSpec(shape, lambda b, _s=shape: (0,) * len(_s))

    out = pl.pallas_call(
        _net_kernel,
        out_shape=jax.ShapeDtypeStruct((B, 1, FC2_OUT), jnp.float32),
        grid=(B,),
        in_specs=[
            pl.BlockSpec((1, H0, W0 * C0), lambda b: (b, 0, 0)),   # input image tile
            resident((K, W0 * C0, OW1 * C1)),                      # t1
            resident((3, OW1 * C1)),                               # bias/scale/shift 1
            resident((PH1, OH1 - 1)),                              # sh1
            resident(((OW1 - 1) * C1, PW1 * C1)),                  # sw1
            resident((K, PW1 * C1, OW2 * C2)),                     # t2
            resident((3, OW2 * C2)),                               # bias/scale/shift 2
            resident((PH2, OH2 - 1)),                              # sh2
            resident(((OW2 - 1) * C2, PW2 * C2)),                  # sw2
            resident((PH2, PW2 * C2, FC1_OUT)),                    # fc1 weights (permuted)
            resident((1, FC1_OUT)),                                # fc1 bias
            resident((FC1_OUT, FC2_OUT)),                          # fc2 weights
            resident((1, FC2_OUT)),                                # fc2 bias
        ],
        out_specs=pl.BlockSpec((1, 1, FC2_OUT), lambda b: (b, 0, 0)),
        compiler_params=pltpu.CompilerParams(
            dimension_semantics=("parallel",)),
    )(x_rows, *ops)
    return out.reshape(B, FC2_OUT)


net_forward = jax.jit(_net_forward)


# ---------------------------------------------------------------------------
# Deterministic synthetic parameters + pure-JAX reference
# ---------------------------------------------------------------------------
def init_params(key):
    ks = jax.random.split(key, 20)

    def uni(k, shape, fan_in):
        bound = 1.0 / math.sqrt(fan_in)
        return jax.random.uniform(k, shape, jnp.float32, -bound, bound)

    p = {}
    p["conv1_w"] = uni(ks[0], (8, 3, 3, 3), 3 * 3 * 3)
    p["conv1_b"] = uni(ks[1], (8,), 3 * 3 * 3)
    p["bn1_gamma"] = 1.0 + 0.1 * jax.random.normal(ks[2], (8,), jnp.float32)
    p["bn1_beta"] = 0.1 * jax.random.normal(ks[3], (8,), jnp.float32)
    p["bn1_mean"] = 0.1 * jax.random.normal(ks[4], (8,), jnp.float32)
    p["bn1_var"] = 0.5 + jnp.abs(jax.random.normal(ks[5], (8,), jnp.float32))
    p["conv2_w"] = uni(ks[6], (16, 8, 3, 3), 8 * 3 * 3)
    p["conv2_b"] = uni(ks[7], (16,), 8 * 3 * 3)
    p["bn2_gamma"] = 1.0 + 0.1 * jax.random.normal(ks[8], (16,), jnp.float32)
    p["bn2_beta"] = 0.1 * jax.random.normal(ks[9], (16,), jnp.float32)
    p["bn2_mean"] = 0.1 * jax.random.normal(ks[10], (16,), jnp.float32)
    p["bn2_var"] = 0.5 + jnp.abs(jax.random.normal(ks[11], (16,), jnp.float32))
    p["fc1_w"] = uni(ks[12], (32, 576), 576)
    p["fc1_b"] = uni(ks[13], (32,), 576)
    p["fc2_w"] = uni(ks[14], (10, 32), 32)
    p["fc2_b"] = uni(ks[15], (10,), 32)
    return p


def net_reference(params, x):
    def bn(y, g, b, m, v):
        s = g / jnp.sqrt(v + BN_EPS)
        return y * s[None, :, None, None] + (b - m * s)[None, :, None, None]

    dn = ("NCHW", "OIHW", "NCHW")
    hp = jax.lax.Precision.HIGHEST
    y = jax.lax.conv_general_dilated(x, params["conv1_w"], (1, 1), "VALID",
                                     dimension_numbers=dn, precision=hp)
    y = jnp.maximum(y + params["conv1_b"][None, :, None, None], 0.0)
    y = bn(y, params["bn1_gamma"], params["bn1_beta"], params["bn1_mean"], params["bn1_var"])
    y = jax.lax.reduce_window(y, -jnp.inf, jax.lax.max, (1, 1, 2, 2), (1, 1, 2, 2), "VALID")

    y = jax.lax.conv_general_dilated(y, params["conv2_w"], (1, 1), "VALID",
                                     dimension_numbers=dn, precision=hp)
    y = jnp.maximum(y + params["conv2_b"][None, :, None, None], 0.0)
    y = bn(y, params["bn2_gamma"], params["bn2_beta"], params["bn2_mean"], params["bn2_var"])
    y = jax.lax.reduce_window(y, -jnp.inf, jax.lax.max, (1, 1, 2, 2), (1, 1, 2, 2), "VALID")

    y = y.reshape(y.shape[0], -1)
    y = jnp.maximum(y @ params["fc1_w"].T + params["fc1_b"], 0.0)
    return y @ params["fc2_w"].T + params["fc2_b"]


if __name__ == "__main__":
    key = jax.random.PRNGKey(0)
    pkey, xkey = jax.random.split(key)
    params = init_params(pkey)
    x = jax.random.normal(xkey, (2, C0, H0, W0), jnp.float32)

    out = jax.block_until_ready(net_forward(params, x))
    assert out.shape == (2, FC2_OUT) and out.dtype == jnp.float32
    assert bool(jnp.all(jnp.isfinite(out)))

    ref = net_reference(params, x)
    assert bool(jnp.allclose(out, ref, atol=5e-2, rtol=5e-2)), (
        f"max abs err {float(jnp.max(jnp.abs(out - ref)))}")
    print("KERNEL_OK")
</pallas_src>

<mosaic_0001>
module attributes {stable_mosaic.version = 11 : i64} {
  func.func @_net_kernel(%arg0: i32, %arg1: memref<1x32x96xf32, #tpu.memory_space<vmem>>, %arg2: memref<3x96x240xf32, #tpu.memory_space<vmem>>, %arg3: memref<3x240xf32, #tpu.memory_space<vmem>>, %arg4: memref<15x29xf32, #tpu.memory_space<vmem>>, %arg5: memref<232x120xf32, #tpu.memory_space<vmem>>, %arg6: memref<3x120x208xf32, #tpu.memory_space<vmem>>, %arg7: memref<3x208xf32, #tpu.memory_space<vmem>>, %arg8: memref<6x12xf32, #tpu.memory_space<vmem>>, %arg9: memref<192x96xf32, #tpu.memory_space<vmem>>, %arg10: memref<6x96x32xf32, #tpu.memory_space<vmem>>, %arg11: memref<1x32xf32, #tpu.memory_space<vmem>>, %arg12: memref<32x10xf32, #tpu.memory_space<vmem>>, %arg13: memref<1x10xf32, #tpu.memory_space<vmem>>, %arg14: memref<1x1x10xf32, #tpu.memory_space<vmem>>) attributes {dimension_semantics = [#tpu.dimension_semantics<parallel>], iteration_bounds = array<i64: 2>, scalar_prefetch = 0 : i64, scratch_operands = 0 : i64, tpu.core_type = #tpu.core_type<tc>, window_params = [{transform_indices = @transform_0, window_bounds = array<i64: 1, 32, 96>}, {pipeline_mode = #tpu.pipeline_mode<synchronous>, transform_indices = @transform_1, window_bounds = array<i64: 3, 96, 240>}, {pipeline_mode = #tpu.pipeline_mode<synchronous>, transform_indices = @transform_2, window_bounds = array<i64: 3, 240>}, {pipeline_mode = #tpu.pipeline_mode<synchronous>, transform_indices = @transform_3, window_bounds = array<i64: 15, 29>}, {pipeline_mode = #tpu.pipeline_mode<synchronous>, transform_indices = @transform_4, window_bounds = array<i64: 232, 120>}, {pipeline_mode = #tpu.pipeline_mode<synchronous>, transform_indices = @transform_5, window_bounds = array<i64: 3, 120, 208>}, {pipeline_mode = #tpu.pipeline_mode<synchronous>, transform_indices = @transform_6, window_bounds = array<i64: 3, 208>}, {pipeline_mode = #tpu.pipeline_mode<synchronous>, transform_indices = @transform_7, window_bounds = array<i64: 6, 12>}, {pipeline_mode = #tpu.pipeline_mode<synchronous>, transform_indices = @transform_8, window_bounds = array<i64: 192, 96>}, {pipeline_mode = #tpu.pipeline_mode<synchronous>, transform_indices = @transform_9, window_bounds = array<i64: 6, 96, 32>}, {pipeline_mode = #tpu.pipeline_mode<synchronous>, transform_indices = @transform_10, window_bounds = array<i64: 1, 32>}, {pipeline_mode = #tpu.pipeline_mode<synchronous>, transform_indices = @transform_11, window_bounds = array<i64: 32, 10>}, {pipeline_mode = #tpu.pipeline_mode<synchronous>, transform_indices = @transform_12, window_bounds = array<i64: 1, 10>}, {transform_indices = @transform_13, window_bounds = array<i64: 1, 1, 10>}]} {
    %c0 = arith.constant 0 : index
    %c0_0 = arith.constant 0 : index
    %c0_1 = arith.constant 0 : index
    %0 = vector.load %arg1[%c0, %c0_0, %c0_1] : memref<1x32x96xf32, #tpu.memory_space<vmem>>, vector<1x32x96xf32>
    %1 = vector.shape_cast %0 : vector<1x32x96xf32> to vector<32x96xf32>
    %2 = vector.extract_strided_slice %1 {offsets = [0, 0], sizes = [30, 96], strides = [1, 1]} : vector<32x96xf32> to vector<30x96xf32>
    %c0_2 = arith.constant 0 : index
    %c0_3 = arith.constant 0 : index
    %c0_4 = arith.constant 0 : index
    %3 = vector.load %arg2[%c0_2, %c0_3, %c0_4] : memref<3x96x240xf32, #tpu.memory_space<vmem>>, vector<1x96x240xf32>
    %4 = vector.shape_cast %3 : vector<1x96x240xf32> to vector<96x240xf32>
    %cst = arith.constant dense<0.000000e+00> : vector<30x240xf32>
    %5 = tpu.matmul %2, %4, %cst {dimension_numbers = #tpu.dot_dimension_numbers<[1], [0], [0], [1], [0, 0, 1, 1], [], []>} : vector<30x96xf32>, vector<96x240xf32>, vector<30x240xf32> -> vector<30x240xf32>
    %6 = vector.extract_strided_slice %1 {offsets = [1, 0], sizes = [30, 96], strides = [1, 1]} : vector<32x96xf32> to vector<30x96xf32>
    %c1 = arith.constant 1 : index
    %c0_5 = arith.constant 0 : index
    %c0_6 = arith.constant 0 : index
    %7 = vector.load %arg2[%c1, %c0_5, %c0_6] : memref<3x96x240xf32, #tpu.memory_space<vmem>>, vector<1x96x240xf32>
    %8 = vector.shape_cast %7 : vector<1x96x240xf32> to vector<96x240xf32>
    %cst_7 = arith.constant dense<0.000000e+00> : vector<30x240xf32>
    %9 = tpu.matmul %6, %8, %cst_7 {dimension_numbers = #tpu.dot_dimension_numbers<[1], [0], [0], [1], [0, 0, 1, 1], [], []>} : vector<30x96xf32>, vector<96x240xf32>, vector<30x240xf32> -> vector<30x240xf32>
    %10 = arith.addf %5, %9 : vector<30x240xf32>
    %11 = vector.extract_strided_slice %1 {offsets = [2, 0], sizes = [30, 96], strides = [1, 1]} : vector<32x96xf32> to vector<30x96xf32>
    %c2 = arith.constant 2 : index
    %c0_8 = arith.constant 0 : index
    %c0_9 = arith.constant 0 : index
    %12 = vector.load %arg2[%c2, %c0_8, %c0_9] : memref<3x96x240xf32, #tpu.memory_space<vmem>>, vector<1x96x240xf32>
    %13 = vector.shape_cast %12 : vector<1x96x240xf32> to vector<96x240xf32>
    %cst_10 = arith.constant dense<0.000000e+00> : vector<30x240xf32>
    %14 = tpu.matmul %11, %13, %cst_10 {dimension_numbers = #tpu.dot_dimension_numbers<[1], [0], [0], [1], [0, 0, 1, 1], [], []>} : vector<30x96xf32>, vector<96x240xf32>, vector<30x240xf32> -> vector<30x240xf32>
    %15 = arith.addf %10, %14 : vector<30x240xf32>
    %c0_11 = arith.constant 0 : index
    %c0_12 = arith.constant 0 : index
    %16 = vector.load %arg3[%c0_11, %c0_12] : memref<3x240xf32, #tpu.memory_space<vmem>>, vector<1x240xf32>
    %17 = vector.broadcast %16 : vector<1x240xf32> to vector<30x240xf32>
    %18 = arith.addf %15, %17 : vector<30x240xf32>
    %cst_13 = arith.constant 0.000000e+00 : f32
    %19 = vector.broadcast %cst_13 : f32 to vector<30x240xf32>
    %20 = arith.maximumf %18, %19 : vector<30x240xf32>
    %c1_14 = arith.constant 1 : index
    %c0_15 = arith.constant 0 : index
    %21 = vector.load %arg3[%c1_14, %c0_15] : memref<3x240xf32, #tpu.memory_space<vmem>>, vector<1x240xf32>
    %22 = vector.broadcast %21 : vector<1x240xf32> to vector<30x240xf32>
    %23 = arith.mulf %20, %22 : vector<30x240xf32>
    %c2_16 = arith.constant 2 : index
    %c0_17 = arith.constant 0 : index
    %24 = vector.load %arg3[%c2_16, %c0_17] : memref<3x240xf32, #tpu.memory_space<vmem>>, vector<1x240xf32>
    %25 = vector.broadcast %24 : vector<1x240xf32> to vector<30x240xf32>
    %26 = arith.addf %23, %25 : vector<30x240xf32>
    %27 = vector.extract_strided_slice %26 {offsets = [0, 0], sizes = [29, 240], strides = [1, 1]} : vector<30x240xf32> to vector<29x240xf32>
    %28 = vector.extract_strided_slice %26 {offsets = [1, 0], sizes = [29, 240], strides = [1, 1]} : vector<30x240xf32> to vector<29x240xf32>
    %29 = arith.maximumf %27, %28 : vector<29x240xf32>
    %30 = vector.extract_strided_slice %29 {offsets = [0, 0], sizes = [29, 232], strides = [1, 1]} : vector<29x240xf32> to vector<29x232xf32>
    %31 = vector.extract_strided_slice %29 {offsets = [0, 8], sizes = [29, 232], strides = [1, 1]} : vector<29x240xf32> to vector<29x232xf32>
    %32 = arith.maximumf %30, %31 : vector<29x232xf32>
    %c0_18 = arith.constant 0 : index
    %c0_19 = arith.constant 0 : index
    %33 = vector.load %arg4[%c0_18, %c0_19] : memref<15x29xf32, #tpu.memory_space<vmem>>, vector<15x29xf32>
    %c0_20 = arith.constant 0 : index
    %c0_21 = arith.constant 0 : index
    %34 = vector.load %arg5[%c0_20, %c0_21] : memref<232x120xf32, #tpu.memory_space<vmem>>, vector<232x120xf32>
    %cst_22 = arith.constant dense<0.000000e+00> : vector<29x120xf32>
    %35 = tpu.matmul %32, %34, %cst_22 {dimension_numbers = #tpu.dot_dimension_numbers<[1], [0], [0], [1], [0, 0, 1, 1], [], []>} : vector<29x232xf32>, vector<232x120xf32>, vector<29x120xf32> -> vector<29x120xf32>
    %cst_23 = arith.constant dense<0.000000e+00> : vector<15x120xf32>
    %36 = tpu.matmul %33, %35, %cst_23 {dimension_numbers = #tpu.dot_dimension_numbers<[1], [0], [0], [1], [0, 0, 1, 1], [], []>} : vector<15x29xf32>, vector<29x120xf32>, vector<15x120xf32> -> vector<15x120xf32>
    %37 = vector.extract_strided_slice %36 {offsets = [0, 0], sizes = [13, 120], strides = [1, 1]} : vector<15x120xf32> to vector<13x120xf32>
    %c0_24 = arith.constant 0 : index
    %c0_25 = arith.constant 0 : index
    %c0_26 = arith.constant 0 : index
    %38 = vector.load %arg6[%c0_24, %c0_25, %c0_26] : memref<3x120x208xf32, #tpu.memory_space<vmem>>, vector<1x120x208xf32>
    %39 = vector.shape_cast %38 : vector<1x120x208xf32> to vector<120x208xf32>
    %cst_27 = arith.constant dense<0.000000e+00> : vector<13x208xf32>
    %40 = tpu.matmul %37, %39, %cst_27 {dimension_numbers = #tpu.dot_dimension_numbers<[1], [0], [0], [1], [0, 0, 1, 1], [], []>} : vector<13x120xf32>, vector<120x208xf32>, vector<13x208xf32> -> vector<13x208xf32>
    %41 = vector.extract_strided_slice %36 {offsets = [1, 0], sizes = [13, 120], strides = [1, 1]} : vector<15x120xf32> to vector<13x120xf32>
    %c1_28 = arith.constant 1 : index
    %c0_29 = arith.constant 0 : index
    %c0_30 = arith.constant 0 : index
    %42 = vector.load %arg6[%c1_28, %c0_29, %c0_30] : memref<3x120x208xf32, #tpu.memory_space<vmem>>, vector<1x120x208xf32>
    %43 = vector.shape_cast %42 : vector<1x120x208xf32> to vector<120x208xf32>
    %cst_31 = arith.constant dense<0.000000e+00> : vector<13x208xf32>
    %44 = tpu.matmul %41, %43, %cst_31 {dimension_numbers = #tpu.dot_dimension_numbers<[1], [0], [0], [1], [0, 0, 1, 1], [], []>} : vector<13x120xf32>, vector<120x208xf32>, vector<13x208xf32> -> vector<13x208xf32>
    %45 = arith.addf %40, %44 : vector<13x208xf32>
    %46 = vector.extract_strided_slice %36 {offsets = [2, 0], sizes = [13, 120], strides = [1, 1]} : vector<15x120xf32> to vector<13x120xf32>
    %c2_32 = arith.constant 2 : index
    %c0_33 = arith.constant 0 : index
    %c0_34 = arith.constant 0 : index
    %47 = vector.load %arg6[%c2_32, %c0_33, %c0_34] : memref<3x120x208xf32, #tpu.memory_space<vmem>>, vector<1x120x208xf32>
    %48 = vector.shape_cast %47 : vector<1x120x208xf32> to vector<120x208xf32>
    %cst_35 = arith.constant dense<0.000000e+00> : vector<13x208xf32>
    %49 = tpu.matmul %46, %48, %cst_35 {dimension_numbers = #tpu.dot_dimension_numbers<[1], [0], [0], [1], [0, 0, 1, 1], [], []>} : vector<13x120xf32>, vector<120x208xf32>, vector<13x208xf32> -> vector<13x208xf32>
    %50 = arith.addf %45, %49 : vector<13x208xf32>
    %c0_36 = arith.constant 0 : index
    %c0_37 = arith.constant 0 : index
    %51 = vector.load %arg7[%c0_36, %c0_37] : memref<3x208xf32, #tpu.memory_space<vmem>>, vector<1x208xf32>
    %52 = vector.broadcast %51 : vector<1x208xf32> to vector<13x208xf32>
    %53 = arith.addf %50, %52 : vector<13x208xf32>
    %cst_38 = arith.constant 0.000000e+00 : f32
    %54 = vector.broadcast %cst_38 : f32 to vector<13x208xf32>
    %55 = arith.maximumf %53, %54 : vector<13x208xf32>
    %c1_39 = arith.constant 1 : index
    %c0_40 = arith.constant 0 : index
    %56 = vector.load %arg7[%c1_39, %c0_40] : memref<3x208xf32, #tpu.memory_space<vmem>>, vector<1x208xf32>
    %57 = vector.broadcast %56 : vector<1x208xf32> to vector<13x208xf32>
    %58 = arith.mulf %55, %57 : vector<13x208xf32>
    %c2_41 = arith.constant 2 : index
    %c0_42 = arith.constant 0 : index
    %59 = vector.load %arg7[%c2_41, %c0_42] : memref<3x208xf32, #tpu.memory_space<vmem>>, vector<1x208xf32>
    %60 = vector.broadcast %59 : vector<1x208xf32> to vector<13x208xf32>
    %61 = arith.addf %58, %60 : vector<13x208xf32>
    %62 = vector.extract_strided_slice %61 {offsets = [0, 0], sizes = [12, 208], strides = [1, 1]} : vector<13x208xf32> to vector<12x208xf32>
    %63 = vector.extract_strided_slice %61 {offsets = [1, 0], sizes = [12, 208], strides = [1, 1]} : vector<13x208xf32> to vector<12x208xf32>
    %64 = arith.maximumf %62, %63 : vector<12x208xf32>
    %65 = vector.extract_strided_slice %64 {offsets = [0, 0], sizes = [12, 192], strides = [1, 1]} : vector<12x208xf32> to vector<12x192xf32>
    %66 = vector.extract_strided_slice %64 {offsets = [0, 16], sizes = [12, 192], strides = [1, 1]} : vector<12x208xf32> to vector<12x192xf32>
    %67 = arith.maximumf %65, %66 : vector<12x192xf32>
    %c0_43 = arith.constant 0 : index
    %c0_44 = arith.constant 0 : index
    %68 = vector.load %arg8[%c0_43, %c0_44] : memref<6x12xf32, #tpu.memory_space<vmem>>, vector<6x12xf32>
    %c0_45 = arith.constant 0 : index
    %c0_46 = arith.constant 0 : index
    %69 = vector.load %arg9[%c0_45, %c0_46] : memref<192x96xf32, #tpu.memory_space<vmem>>, vector<192x96xf32>
    %cst_47 = arith.constant dense<0.000000e+00> : vector<12x96xf32>
    %70 = tpu.matmul %67, %69, %cst_47 {dimension_numbers = #tpu.dot_dimension_numbers<[1], [0], [0], [1], [0, 0, 1, 1], [], []>} : vector<12x192xf32>, vector<192x96xf32>, vector<12x96xf32> -> vector<12x96xf32>
    %cst_48 = arith.constant dense<0.000000e+00> : vector<6x96xf32>
    %71 = tpu.matmul %68, %70, %cst_48 {dimension_numbers = #tpu.dot_dimension_numbers<[1], [0], [0], [1], [0, 0, 1, 1], [], []>} : vector<6x12xf32>, vector<12x96xf32>, vector<6x96xf32> -> vector<6x96xf32>
    %c0_49 = arith.constant 0 : index
    %c0_50 = arith.constant 0 : index
    %72 = vector.load %arg11[%c0_49, %c0_50] : memref<1x32xf32, #tpu.memory_space<vmem>>, vector<1x32xf32>
    %73 = vector.extract_strided_slice %71 {offsets = [0, 0], sizes = [1, 96], strides = [1, 1]} : vector<6x96xf32> to vector<1x96xf32>
    %c0_51 = arith.constant 0 : index
    %c0_52 = arith.constant 0 : index
    %c0_53 = arith.constant 0 : index
    %74 = vector.load %arg10[%c0_51, %c0_52, %c0_53] : memref<6x96x32xf32, #tpu.memory_space<vmem>>, vector<1x96x32xf32>
    %75 = vector.shape_cast %74 : vector<1x96x32xf32> to vector<96x32xf32>
    %cst_54 = arith.constant dense<0.000000e+00> : vector<1x32xf32>
    %76 = tpu.matmul %73, %75, %cst_54 {dimension_numbers = #tpu.dot_dimension_numbers<[1], [0], [0], [1], [0, 0, 1, 1], [], []>} : vector<1x96xf32>, vector<96x32xf32>, vector<1x32xf32> -> vector<1x32xf32>
    %77 = arith.addf %72, %76 : vector<1x32xf32>
    %78 = vector.extract_strided_slice %71 {offsets = [1, 0], sizes = [1, 96], strides = [1, 1]} : vector<6x96xf32> to vector<1x96xf32>
    %c1_55 = arith.constant 1 : index
    %c0_56 = arith.constant 0 : index
    %c0_57 = arith.constant 0 : index
    %79 = vector.load %arg10[%c1_55, %c0_56, %c0_57] : memref<6x96x32xf32, #tpu.memory_space<vmem>>, vector<1x96x32xf32>
    %80 = vector.shape_cast %79 : vector<1x96x32xf32> to vector<96x32xf32>
    %cst_58 = arith.constant dense<0.000000e+00> : vector<1x32xf32>
    %81 = tpu.matmul %78, %80, %cst_58 {dimension_numbers = #tpu.dot_dimension_numbers<[1], [0], [0], [1], [0, 0, 1, 1], [], []>} : vector<1x96xf32>, vector<96x32xf32>, vector<1x32xf32> -> vector<1x32xf32>
    %82 = arith.addf %77, %81 : vector<1x32xf32>
    %83 = vector.extract_strided_slice %71 {offsets = [2, 0], sizes = [1, 96], strides = [1, 1]} : vector<6x96xf32> to vector<1x96xf32>
    %c2_59 = arith.constant 2 : index
    %c0_60 = arith.constant 0 : index
    %c0_61 = arith.constant 0 : index
    %84 = vector.load %arg10[%c2_59, %c0_60, %c0_61] : memref<6x96x32xf32, #tpu.memory_space<vmem>>, vector<1x96x32xf32>
    %85 = vector.shape_cast %84 : vector<1x96x32xf32> to vector<96x32xf32>
    %cst_62 = arith.constant dense<0.000000e+00> : vector<1x32xf32>
    %86 = tpu.matmul %83, %85, %cst_62 {dimension_numbers = #tpu.dot_dimension_numbers<[1], [0], [0], [1], [0, 0, 1, 1], [], []>} : vector<1x96xf32>, vector<96x32xf32>, vector<1x32xf32> -> vector<1x32xf32>
    %87 = arith.addf %82, %86 : vector<1x32xf32>
    %88 = vector.extract_strided_slice %71 {offsets = [3, 0], sizes = [1, 96], strides = [1, 1]} : vector<6x96xf32> to vector<1x96xf32>
    %c3 = arith.constant 3 : index
    %c0_63 = arith.constant 0 : index
    %c0_64 = arith.constant 0 : index
    %89 = vector.load %arg10[%c3, %c0_63, %c0_64] : memref<6x96x32xf32, #tpu.memory_space<vmem>>, vector<1x96x32xf32>
    %90 = vector.shape_cast %89 : vector<1x96x32xf32> to vector<96x32xf32>
    %cst_65 = arith.constant dense<0.000000e+00> : vector<1x32xf32>
    %91 = tpu.matmul %88, %90, %cst_65 {dimension_numbers = #tpu.dot_dimension_numbers<[1], [0], [0], [1], [0, 0, 1, 1], [], []>} : vector<1x96xf32>, vector<96x32xf32>, vector<1x32xf32> -> vector<1x32xf32>
    %92 = arith.addf %87, %91 : vector<1x32xf32>
    %93 = vector.extract_strided_slice %71 {offsets = [4, 0], sizes = [1, 96], strides = [1, 1]} : vector<6x96xf32> to vector<1x96xf32>
    %c4 = arith.constant 4 : index
    %c0_66 = arith.constant 0 : index
    %c0_67 = arith.constant 0 : index
    %94 = vector.load %arg10[%c4, %c0_66, %c0_67] : memref<6x96x32xf32, #tpu.memory_space<vmem>>, vector<1x96x32xf32>
    %95 = vector.shape_cast %94 : vector<1x96x32xf32> to vector<96x32xf32>
    %cst_68 = arith.constant dense<0.000000e+00> : vector<1x32xf32>
    %96 = tpu.matmul %93, %95, %cst_68 {dimension_numbers = #tpu.dot_dimension_numbers<[1], [0], [0], [1], [0, 0, 1, 1], [], []>} : vector<1x96xf32>, vector<96x32xf32>, vector<1x32xf32> -> vector<1x32xf32>
    %97 = arith.addf %92, %96 : vector<1x32xf32>
    %98 = vector.extract_strided_slice %71 {offsets = [5, 0], sizes = [1, 96], strides = [1, 1]} : vector<6x96xf32> to vector<1x96xf32>
    %c5 = arith.constant 5 : index
    %c0_69 = arith.constant 0 : index
    %c0_70 = arith.constant 0 : index
    %99 = vector.load %arg10[%c5, %c0_69, %c0_70] : memref<6x96x32xf32, #tpu.memory_space<vmem>>, vector<1x96x32xf32>
    %100 = vector.shape_cast %99 : vector<1x96x32xf32> to vector<96x32xf32>
    %cst_71 = arith.constant dense<0.000000e+00> : vector<1x32xf32>
    %101 = tpu.matmul %98, %100, %cst_71 {dimension_numbers = #tpu.dot_dimension_numbers<[1], [0], [0], [1], [0, 0, 1, 1], [], []>} : vector<1x96xf32>, vector<96x32xf32>, vector<1x32xf32> -> vector<1x32xf32>
    %102 = arith.addf %97, %101 : vector<1x32xf32>
    %cst_72 = arith.constant 0.000000e+00 : f32
    %103 = vector.broadcast %cst_72 : f32 to vector<1x32xf32>
    %104 = arith.maximumf %102, %103 : vector<1x32xf32>
    %c0_73 = arith.constant 0 : index
    %c0_74 = arith.constant 0 : index
    %105 = vector.load %arg12[%c0_73, %c0_74] : memref<32x10xf32, #tpu.memory_space<vmem>>, vector<32x10xf32>
    %cst_75 = arith.constant dense<0.000000e+00> : vector<1x10xf32>
    %106 = tpu.matmul %104, %105, %cst_75 {dimension_numbers = #tpu.dot_dimension_numbers<[1], [0], [0], [1], [0, 0, 1, 1], [], []>} : vector<1x32xf32>, vector<32x10xf32>, vector<1x10xf32> -> vector<1x10xf32>
    %c0_76 = arith.constant 0 : index
    %c0_77 = arith.constant 0 : index
    %107 = vector.load %arg13[%c0_76, %c0_77] : memref<1x10xf32, #tpu.memory_space<vmem>>, vector<1x10xf32>
    %108 = arith.addf %106, %107 : vector<1x10xf32>
    %c0_78 = arith.constant 0 : index
    %c0_79 = arith.constant 0 : index
    %c0_80 = arith.constant 0 : index
    %109 = vector.load %arg14[%c0_78, %c0_79, %c0_80] : memref<1x1x10xf32, #tpu.memory_space<vmem>>, vector<1x1x10xf32>
    %110 = vector.shape_cast %109 : vector<1x1x10xf32> to vector<1x10xf32>
    %111 = vector.shape_cast %108 : vector<1x10xf32> to vector<1x1x10xf32>
    tpu.vector_store %arg14[%c0_78, %c0_79, %c0_80], %111 {strides = array<i32>} : memref<1x1x10xf32, #tpu.memory_space<vmem>>, vector<1x1x10xf32>,
    return
  }
  func.func @transform_0(%arg0: i32) -> (i32, i32, i32) {
    %c0_i32 = arith.constant 0 : i32
    %c0_i32_0 = arith.constant 0 : i32
    %c0_i32_1 = arith.constant 0 : i32
    return %arg0, %c0_i32, %c0_i32_0 : i32, i32, i32
  }
  func.func @transform_1(%arg0: i32) -> (i32, i32, i32) {
    %c0_i32 = arith.constant 0 : i32
    %c0_i32_0 = arith.constant 0 : i32
    %c0_i32_1 = arith.constant 0 : i32
    %c0_i32_2 = arith.constant 0 : i32
    return %c0_i32, %c0_i32_0, %c0_i32_1 : i32, i32, i32
  }
  func.func @transform_2(%arg0: i32) -> (i32, i32) {
    %c0_i32 = arith.constant 0 : i32
    %c0_i32_0 = arith.constant 0 : i32
    %c0_i32_1 = arith.constant 0 : i32
    return %c0_i32, %c0_i32_0 : i32, i32
  }
  func.func @transform_3(%arg0: i32) -> (i32, i32) {
    %c0_i32 = arith.constant 0 : i32
    %c0_i32_0 = arith.constant 0 : i32
    %c0_i32_1 = arith.constant 0 : i32
    return %c0_i32, %c0_i32_0 : i32, i32
  }
  func.func @transform_4(%arg0: i32) -> (i32, i32) {
    %c0_i32 = arith.constant 0 : i32
    %c0_i32_0 = arith.constant 0 : i32
    %c0_i32_1 = arith.constant 0 : i32
    return %c0_i32, %c0_i32_0 : i32, i32
  }
  func.func @transform_5(%arg0: i32) -> (i32, i32, i32) {
    %c0_i32 = arith.constant 0 : i32
    %c0_i32_0 = arith.constant 0 : i32
    %c0_i32_1 = arith.constant 0 : i32
    %c0_i32_2 = arith.constant 0 : i32
    return %c0_i32, %c0_i32_0, %c0_i32_1 : i32, i32, i32
  }
  func.func @transform_6(%arg0: i32) -> (i32, i32) {
    %c0_i32 = arith.constant 0 : i32
    %c0_i32_0 = arith.constant 0 : i32
    %c0_i32_1 = arith.constant 0 : i32
    return %c0_i32, %c0_i32_0 : i32, i32
  }
  func.func @transform_7(%arg0: i32) -> (i32, i32) {
    %c0_i32 = arith.constant 0 : i32
    %c0_i32_0 = arith.constant 0 : i32
    %c0_i32_1 = arith.constant 0 : i32
    return %c0_i32, %c0_i32_0 : i32, i32
  }
  func.func @transform_8(%arg0: i32) -> (i32, i32) {
    %c0_i32 = arith.constant 0 : i32
    %c0_i32_0 = arith.constant 0 : i32
    %c0_i32_1 = arith.constant 0 : i32
    return %c0_i32, %c0_i32_0 : i32, i32
  }
  func.func @transform_9(%arg0: i32) -> (i32, i32, i32) {
    %c0_i32 = arith.constant 0 : i32
    %c0_i32_0 = arith.constant 0 : i32
    %c0_i32_1 = arith.constant 0 : i32
    %c0_i32_2 = arith.constant 0 : i32
    return %c0_i32, %c0_i32_0, %c0_i32_1 : i32, i32, i32
  }
  func.func @transform_10(%arg0: i32) -> (i32, i32) {
    %c0_i32 = arith.constant 0 : i32
    %c0_i32_0 = arith.constant 0 : i32
    %c0_i32_1 = arith.constant 0 : i32
    return %c0_i32, %c0_i32_0 : i32, i32
  }
  func.func @transform_11(%arg0: i32) -> (i32, i32) {
    %c0_i32 = arith.constant 0 : i32
    %c0_i32_0 = arith.constant 0 : i32
    %c0_i32_1 = arith.constant 0 : i32
    return %c0_i32, %c0_i32_0 : i32, i32
  }
  func.func @transform_12(%arg0: i32) -> (i32, i32) {
    %c0_i32 = arith.constant 0 : i32
    %c0_i32_0 = arith.constant 0 : i32
    %c0_i32_1 = arith.constant 0 : i32
    return %c0_i32, %c0_i32_0 : i32, i32
  }
  func.func @transform_13(%arg0: i32) -> (i32, i32, i32) {
    %c0_i32 = arith.constant 0 : i32
    %c0_i32_0 = arith.constant 0 : i32
    %c0_i32_1 = arith.constant 0 : i32
    return %arg0, %c0_i32, %c0_i32_0 : i32, i32, i32
  }
}

</mosaic_0001>

<bundles_post_ra>
// kernel: tile.41
= control target key start
LH: loop header
LB: loop body
LE: loop exit
PB: predicated region body
PF: predicated region fallthrough
CT: control target
= control target key end

     0   :  { %s40_s0 = inlined_call_operand.vmem [shape: f32[8], index: 0, kind: input, shape index: {}]   ;;  %s41_s1 = inlined_call_operand.vmem [shape: f32[30,8], index: 1, kind: output, shape index: {}]  }
   0x1   :  { %v4_v0 = vld [vmem:[%s40_s0] ss:$0 sm:$0xff] }
   0x2   :  { %5 = vst [vmem:[%s41_s1] sm:$0xff] %v4_v0  ;;  %12 = vst [vmem:[%s41_s1 + $0x8] sm:$0xff] %v4_v0 }
   0x3   :  { %13 = vst [vmem:[%s41_s1 + $0x10] sm:$0xff] %v4_v0  ;;  %14 = vst [vmem:[%s41_s1 + $0x18] sm:$0xff] %v4_v0 }

// kernel: tile.44
= control target key start
LH: loop header
LB: loop body
LE: loop exit
PB: predicated region body
PF: predicated region fallthrough
CT: control target
= control target key end

     0   :  { %s19_s8 = smov 3  ;;  %s154_s9 = smov 120   ;;  %vm4_vm0 = vcmask 64512   ;;  %vm10_vm1 = vcmask 1048512   ;;  %vm16_vm2 = vcmask 982912   ;;  %vm23_vm3 = vcmask 917312   ;;  %s233_s0 = inlined_call_operand.vmem [shape: f32[30,8], index: 0, kind: input, shape index: {}]   ;;  %s234_s1 = inlined_call_operand.vmem [shape: f32[1,240], index: 1, kind: output, shape index: {}]  }
   0x1   :  { %v123_v0 = vld [vmem:[%s233_s0 + $0xf] sm:$0x1]   ;;  %v125_v1 = vld [vmem:[%s233_s0 + $0xd] ss:$16 sm:%s19_s8]   ;;  %s155_s12 = smov 104   ;;  %s26_s15 = smov 3 }
   0x2   :  { %8 = vrot.lane.b32.xlu0 %v123_v0, %s154_s9  ;;  %21 = vrot.lane.b32.xlu1 %v125_v1, %s155_s12  ;;  %v124_v2 = vld [vmem:[%s233_s0 + $0xe] sm:$0x1]   ;;  %s33_s18 = smov 3  ;;  %s40_s19 = smov 3  ;;  %vm30_vm4 = vcmask 851712   ;;  %vm37_vm5 = vcmask 786112  }
   0x3   :  { %v126_v3 = vld [vmem:[%s233_s0 + $0xc] ss:$16 sm:%s26_s15]   ;;  %s156_s20 = smov 112   ;;  %s157_s21 = smov 96   ;;  %v127_v4 = vld [vmem:[%s233_s0 + $0xb] ss:$16 sm:%s33_s18]  }
   0x4   :  { %v128_v5 = vld [vmem:[%s233_s0 + $0xa] ss:$16 sm:%s40_s19]   ;;  %s47_s26 = smov 3  ;;  %s54_s27 = smov 3  ;;  %vm44_vm6 = vcmask 720512   ;;  %vm51_vm7 = vcmask 654912  }
   0x5   :  { %s158_s28 = smov 88   ;;  %s159_s29 = smov 80   ;;  %v129_v6 = vld [vmem:[%s233_s0 + $0x9] ss:$16 sm:%s47_s26]   ;;  %v130_v7 = vld [vmem:[%s233_s0 + $0x8] ss:$16 sm:%s54_s27]  }
   0x6   :  { %14 = vrot.lane.b32.xlu0 %v124_v2, %s156_s20  ;;  %28 = vrot.lane.b32.xlu1 %v126_v3, %s157_s21  ;;  %s61_s5 = smov 3  ;;  %s68_s6 = smov 3  ;;  %vm58_vm8 = vcmask 589312   ;;  %vm65_vm9 = vcmask 523712   ;;  %vm72_vm10 = vcmask 458112   ;;  %vm79_vm11 = vcmask 392512  }
   0x7   :  { %s160_s7 = smov 72   ;;  %s161_s8 = smov 64   ;;  %v131_v8 = vld [vmem:[%s233_s0 + $0x7] ss:$16 sm:%s61_s5]   ;;  %v132_v9 = vld [vmem:[%s233_s0 + $0x6] ss:$16 sm:%s68_s6]  }
   0x8   :  { %s2_s11 = smov 3  ;;  %s75_s14 = smov 3  ;;  %vm86_vm12 = vcmask 326912   ;;  %vm93_vm13 = vcmask 261312   ;;  %vm100_vm14 = vcmask 195712   ;;  %vm107_vm15 = vcmask 130112  }
   0x9   :  { %v3_v10 = vld [vmem:[%s233_s0] ss:$16 sm:%s2_s11]   ;;  %s82_s17 = smov 3  ;;  %s162_s18 = smov 56   ;;  %v133_v11 = vld [vmem:[%s233_s0 + $0x5] ss:$16 sm:%s75_s14]  }
   0xa   :  { %35 = vrot.lane.b32.xlu0 %v127_v4, %s158_s28  ;;  %42 = vrot.lane.b32.xlu1 %v128_v5, %s159_s29  ;;  %5 = vst.msk [vmem:[#allocation0] ss:$8 sm:$0x3] %vm4_vm0, %v3_v10   ;;  %s163_s19 = smov 48   ;;  %v134_v12 = vld [vmem:[%s233_s0 + $0x4] ss:$16 sm:%s82_s17]  }
   0xb   :  { %s89_s24 = smov 3  ;;  %s96_s25 = smov 3 }
   0xc   :  { %s164_s26 = smov 40   ;;  %s165_s27 = smov 32   ;;  %v135_v13 = vld [vmem:[%s233_s0 + $0x3] ss:$16 sm:%s89_s24]   ;;  %v136_v14 = vld [vmem:[%s233_s0 + $0x2] ss:$16 sm:%s96_s25]  }
   0xd   :  { %s103_s3 = smov 3  ;;  %s166_s4 = smov 24  }
   0xe   :  { %49 = vrot.lane.b32.xlu0 %v129_v6, %s160_s7  ;;  %56 = vrot.lane.b32.xlu1 %v130_v7, %s161_s8  ;;  %s167_s5 = smov 16   ;;  %v137_v15 = vld [vmem:[%s233_s0 + $0x1] ss:$16 sm:%s103_s3]   ;;  %s168_s0 = smov 8  }
  0x12   :  { %63 = vrot.lane.b32.xlu0 %v131_v8, %s162_s18  ;;  %70 = vrot.lane.b32.xlu1 %v132_v9, %s163_s19 }
  0x16   :  { %77 = vrot.lane.b32.xlu0 %v133_v11, %s164_s26  ;;  %84 = vrot.lane.b32.xlu1 %v134_v12, %s165_s27 }
  0x1a   :  { %91 = vrot.lane.b32.xlu0 %v135_v13, %s166_s4  ;;  %98 = vrot.lane.b32.xlu1 %v136_v14, %s167_s5 }
  0x1e   :  { %105 = vrot.lane.b32.xlu0 %v137_v15, %s168_s0 }
  0x74   :  { %v9_v16 = vpop.permute.xlu0 %8   ;;  %v22_v17 = vpop.permute.xlu1 %21  }
  0x75   :  { %11 = vst.msk [vmem:[#allocation0] sm:$0x1] %vm10_vm1, %v9_v16  }
  0x78   :  { %v15_v18 = vpop.permute.xlu0 %14   ;;  %v29_v19 = vpop.permute.xlu1 %28  }
  0x79   :  { %17 = vst.msk [vmem:[#allocation0] sm:$0x1] %vm16_vm2, %v15_v18  }
  0x7a   :  { %24 = vst.msk [vmem:[#allocation0] ss:$8 sm:$0x3] %vm23_vm3, %v22_v17  }
  0x7b   :  { %31 = vst.msk [vmem:[#allocation0] ss:$8 sm:$0x3] %vm30_vm4, %v29_v19  }
  0x7c   :  { %v36_v20 = vpop.permute.xlu0 %35   ;;  %v43_v21 = vpop.permute.xlu1 %42  }
  0x7d   :  { %38 = vst.msk [vmem:[#allocation0] ss:$8 sm:$0x3] %vm37_vm5, %v36_v20  }
  0x7e   :  { %45 = vst.msk [vmem:[#allocation0] ss:$8 sm:$0x3] %vm44_vm6, %v43_v21  }
  0x80   :  { %v50_v22 = vpop.permute.xlu0 %49   ;;  %v57_v23 = vpop.permute.xlu1 %56  }
  0x81   :  { %52 = vst.msk [vmem:[#allocation0] ss:$8 sm:$0x3] %vm51_vm7, %v50_v22  }
  0x82   :  { %59 = vst.msk [vmem:[#allocation0] ss:$8 sm:$0x3] %vm58_vm8, %v57_v23  }
  0x84   :  { %v64_v24 = vpop.permute.xlu0 %63   ;;  %v71_v25 = vpop.permute.xlu1 %70  }
  0x85   :  { %66 = vst.msk [vmem:[#allocation0] ss:$8 sm:$0x3] %vm65_vm9, %v64_v24  }
  0x86   :  { %73 = vst.msk [vmem:[#allocation0] ss:$8 sm:$0x3] %vm72_vm10, %v71_v25  }
  0x88   :  { %v78_v26 = vpop.permute.xlu0 %77   ;;  %v85_v27 = vpop.permute.xlu1 %84  }
  0x89   :  { %80 = vst.msk [vmem:[#allocation0] ss:$8 sm:$0x3] %vm79_vm11, %v78_v26  }
  0x8a   :  { %87 = vst.msk [vmem:[#allocation0] ss:$8 sm:$0x3] %vm86_vm12, %v85_v27  }
  0x8c   :  { %v92_v28 = vpop.permute.xlu0 %91   ;;  %v99_v29 = vpop.permute.xlu1 %98  }
  0x8d   :  { %94 = vst.msk [vmem:[#allocation0] ss:$8 sm:$0x3] %vm93_vm13, %v92_v28  }
  0x8e   :  { %101 = vst.msk [vmem:[#allocation0] ss:$8 sm:$0x3] %vm100_vm14, %v99_v29  }
  0x90   :  { %v106_v30 = vpop.permute.xlu0 %105  }
  0x91   :  { %108 = vst.msk [vmem:[#allocation0] ss:$8 sm:$0x3] %vm107_vm15, %v106_v30  }
  0x98   :  { %v113_v31 = vld [vmem:[#allocation0] sm:$0x1]  ;;  %v118_v32 = vld [vmem:[#allocation0 + $0x8] sm:$0x1] }
  0x99   :  { %116 = vst [vmem:[%s234_s1] sm:$0x1] %v113_v31  ;;  %138 = vst [vmem:[%s234_s1 + $0x1] sm:$0x1] %v118_v32 }

// kernel: tile.56
= control target key start
LH: loop header
LB: loop body
LE: loop exit
PB: predicated region body
PF: predicated region fallthrough
CT: control target
= control target key end

     0   :  { %s28_s0 = inlined_call_operand.vmem [shape: f32[16], index: 0, kind: input, shape index: {}]   ;;  %s29_s1 = inlined_call_operand.vmem [shape: f32[13,16], index: 1, kind: output, shape index: {}]  }
   0x1   :  { %v4_v0 = vld [vmem:[%s28_s0] ss:$0 sm:$0xff] }
   0x2   :  { %5 = vst [vmem:[%s29_s1] sm:$0xff] %v4_v0  ;;  %8 = vst [vmem:[%s29_s1 + $0x8] sm:$0xff] %v4_v0 }

// kernel: tile.59
= control target key start
LH: loop header
LB: loop body
LE: loop exit
PB: predicated region body
PF: predicated region fallthrough
CT: control target
= control target key end

     0   :  { %s81_s10 = smov 112   ;;  %s82_s11 = smov 80   ;;  %vm4_vm0 = vcmask 130048   ;;  %vm10_vm1 = vcmask 1048448   ;;  %vm16_vm2 = vcmask 917248   ;;  %vm22_vm3 = vcmask 786048   ;;  %s128_s0 = inlined_call_operand.vmem [shape: f32[13,16], index: 0, kind: input, shape index: {}]   ;;  %s129_s1 = inlined_call_operand.vmem [shape: f32[1,208], index: 1, kind: output, shape index: {}]  }
   0x1   :  { %v66_v0 = vld [vmem:[%s128_s0 + $0x7] sm:$0x1]   ;;  %v68_v1 = vld [vmem:[%s128_s0 + $0x5] sm:$0x1]   ;;  %s25_s12 = smov 3  ;;  %s32_s17 = smov 3 }
   0x2   :  { %8 = vrot.lane.b32.xlu0 %v66_v0, %s81_s10  ;;  %20 = vrot.lane.b32.xlu1 %v68_v1, %s82_s11  ;;  %v67_v2 = vld [vmem:[%s128_s0 + $0x6] sm:$0x1]   ;;  %s39_s18 = smov 3  ;;  %s83_s19 = smov 96   ;;  %vm29_vm4 = vcmask 654848   ;;  %vm36_vm5 = vcmask 523648  }
   0x3   :  { %v69_v3 = vld [vmem:[%s128_s0 + $0x4] ss:$8 sm:%s25_s12]   ;;  %s84_s20 = smov 64   ;;  %v70_v4 = vld [vmem:[%s128_s0 + $0x3] ss:$8 sm:%s32_s17]   ;;  %s2_s23 = smov 3 }
   0x4   :  { %v71_v5 = vld [vmem:[%s128_s0 + $0x2] ss:$8 sm:%s39_s18]   ;;  %v3_v6 = vld [vmem:[%s128_s0] ss:$8 sm:%s2_s23]   ;;  %s46_s28 = smov 3  ;;  %s85_s29 = smov 48  }
   0x5   :  { %5 = vst.msk [vmem:[#allocation0] ss:$8 sm:$0x3] %vm4_vm0, %v3_v6   ;;  %s86_s30 = smov 32   ;;  %v72_v7 = vld [vmem:[%s128_s0 + $0x1] ss:$8 sm:%s46_s28]  }
   0x6   :  { %14 = vrot.lane.b32.xlu0 %v67_v2, %s83_s19  ;;  %27 = vrot.lane.b32.xlu1 %v69_v3, %s84_s20  ;;  %s87_s0 = smov 16   ;;  %vm43_vm6 = vcmask 392448   ;;  %vm50_vm7 = vcmask 261248  }
   0xa   :  { %34 = vrot.lane.b32.xlu0 %v70_v4, %s85_s29  ;;  %41 = vrot.lane.b32.xlu1 %v71_v5, %s86_s30 }
   0xe   :  { %48 = vrot.lane.b32.xlu0 %v72_v7, %s87_s0 }
  0x74   :  { %v9_v8 = vpop.permute.xlu0 %8   ;;  %v21_v9 = vpop.permute.xlu1 %20  }
  0x75   :  { %11 = vst.msk [vmem:[#allocation0] sm:$0x1] %vm10_vm1, %v9_v8  }
  0x78   :  { %v15_v10 = vpop.permute.xlu0 %14   ;;  %v28_v11 = vpop.permute.xlu1 %27  }
  0x79   :  { %17 = vst.msk [vmem:[#allocation0] sm:$0x1] %vm16_vm2, %v15_v10  }
  0x7a   :  { %23 = vst.msk [vmem:[#allocation0] sm:$0x1] %vm22_vm3, %v21_v9  }
  0x7b   :  { %30 = vst.msk [vmem:[#allocation0] ss:$8 sm:$0x3] %vm29_vm4, %v28_v11  }
  0x7c   :  { %v35_v12 = vpop.permute.xlu0 %34   ;;  %v42_v13 = vpop.permute.xlu1 %41  }
  0x7d   :  { %37 = vst.msk [vmem:[#allocation0] ss:$8 sm:$0x3] %vm36_vm5, %v35_v12  }
  0x7e   :  { %44 = vst.msk [vmem:[#allocation0] ss:$8 sm:$0x3] %vm43_vm6, %v42_v13  }
  0x80   :  { %v49_v14 = vpop.permute.xlu0 %48  }
  0x81   :  { %51 = vst.msk [vmem:[#allocation0] ss:$8 sm:$0x3] %vm50_vm7, %v49_v14  }
  0x88   :  { %v56_v15 = vld [vmem:[#allocation0] sm:$0x1]  ;;  %v61_v16 = vld [vmem:[#allocation0 + $0x8] sm:$0x1] }
  0x89   :  { %59 = vst [vmem:[%s129_s1] sm:$0x1] %v56_v15  ;;  %73 = vst [vmem:[%s129_s1 + $0x1] sm:$0x1] %v61_v16 }

// kernel: _net_forward.1
= control target key start
LH: loop header
LB: loop body
LE: loop exit
PB: predicated region body
PF: predicated region fallthrough
CT: control target
= control target key end

     0   :  { %18 = vsyncpa [#allocation3], 0  ;;  %s4487_s0 = inlined_call_operand.vmem [shape: f32[2,32,96], index: 0, kind: input, shape index: {}]   ;;  %s4488_s1 = inlined_call_operand.vmem [shape: f32[3,96,240], index: 1, kind: input, shape index: {}]   ;;  %s4489_s2 = inlined_call_operand.vmem [shape: f32[3,240], index: 2, kind: input, shape index: {}]   ;;  %s4490_s3 = inlined_call_operand.vmem [shape: f32[15,29], index: 3, kind: input, shape index: {}]   ;;  %s4491_s4 = inlined_call_operand.vmem [shape: f32[232,120], index: 4, kind: input, shape index: {}]   ;;  %s4492_s5 = inlined_call_operand.vmem [shape: f32[3,120,208], index: 5, kind: input, shape index: {}]   ;;  %s4493_s6 = inlined_call_operand.vmem [shape: f32[3,208], index: 6, kind: input, shape index: {}]   ;;  %s4494_s7 = inlined_call_operand.vmem [shape: f32[6,12], index: 7, kind: input, shape index: {}]   ;;  %s4495_s8 = inlined_call_operand.vmem [shape: f32[192,96], index: 8, kind: input, shape index: {}]   ;;  %s4496_s9 = inlined_call_operand.vmem [shape: f32[6,96,32], index: 9, kind: input, shape index: {}]   ;;  %s4497_s10 = inlined_call_operand.vmem [shape: f32[1,32], index: 10, kind: input, shape index: {}]   ;;  %s4498_s11 = inlined_call_operand.vmem [shape: f32[32,10], index: 11, kind: input, shape index: {}]   ;;  %s4499_s12 = inlined_call_operand.vmem [shape: f32[1,10], index: 12, kind: input, shape index: {}]   ;;  %s4500_s13 = inlined_call_operand.hbm [shape: f32[2,1,10], index: 13, kind: output, shape index: {}]  }
   0x1   :  { %20 = vsyncpa [#allocation3 + $0x1], 0  ;;  %s3184_s25 = smov 0   ;;  %s3186_s26 = smov 0  }
   0x2   :  { %s3188_s27 = smov 0   ;;  %s3190_s28 = smov 0  }
   0x3 LB: > { %4505 = sst [smem:[#allocation5_spill]] %s3103_s27  ;;  %s3205_s29 = sadd.s32 4294967295, %s3107_s28   ;;  %s3107_s28 = sphi %s3190_s28, %s4512_s28   ;;  %s3103_s27 = sphi %s3188_s27, %s4514_s27   ;;  %s3099_s26 = sphi %s3186_s26, %s4516_s26   ;;  %s3095_s25 = sphi %s3184_s25, %s4515_s25  }
   0x4   : > { %s2503_s30 = sadd.s32 4294967294, %s3107_s28   ;;  %s3209_s14 = sadd.s32 1, %s3107_s28  }
   0x5   : > { %4506 = sst [smem:[#allocation6_spill]] %s3209_s14  ;;  %s311_s15 = sadd.s32 1, %s3103_s27 }
   0x6   : > { %s308_s16 = ssub.s32 %s3107_s28, %s3209_s14  ;;  %p321_p0 = scmp.ne.s32.totalorder %s3103_s27, %s3099_s26 }
   0x7   : > { %p309_p1 = scmp.eq.s32.totalorder %s308_s16, 0  ;;  %p322_p2 = scmp.eq.s32.totalorder %s3205_s29, 1 }
   0x8   : > { %p327_p3 = scmp.ne.s32.totalorder %s3099_s26, %s3095_s25  ;;  %p328_p4 = scmp.eq.s32.totalorder %s2503_s30, 1 }
   0x9   : > { %s3220_s17 = scalar_select %p309_p1, %s3103_s27, %s311_s15  }
   0xa   : > { %p3222_p5 = por %p322_p2, %p321_p0  ;;  %p3226_p6 = por %p328_p4, %p327_p3 }
   0xb   : > { %4507 = sst [smem:[#allocation7_spill]] %s3220_s17  ;;  %p2506_p7 = scmp.ge.s32.totalorder %s3107_s28, 1 }
   0xc   : > { %s4509_s19 = scalar_select %p3226_p6, 1, 0 }
   0xd   : > { %p390_p8 = scmp.lt.s32.totalorder %s3107_s28, 3 }
   0xe   : > { %4510 = sst [smem:[#allocation8_spill]] %s4509_s19 }
   0xf   : > { %p391_p9 = pnand %p2506_p7, %p390_p8 }
  0x10   : > { %p433_p10 = scmp.lt.s32.totalorder (!%p391_p9), %s3205_s29, 1  ;;  %s3110_s21 = smov (!%p391_p9), 120  }
  0x11   : > { %394 = sbr.rel (%p391_p9) target bundleno = 2053 (0x805), region = 72  ;;  %s3111_s20 = smov (!%p391_p9), 112  }
  0x16   : > { %v2532_v0 = vld [vmem:[%s4488_s1 + $0x178] sm:$0xff]  ;;  %v2531_v2 = vld [vmem:[%s4488_s1 + $0x170] sm:$0xff]  ;;  %v2530_v4 = vld [vmem:[%s4488_s1 + $0x168] sm:$0xff]  ;;  %s3290_s15 = scalar_select %p433_p10, %s3205_s29, 1  ;;  %vm495_vm0 = vcmask 1046528   ;;  %vm503_vm1 = vcmask 785408  }
  0x17   : > { %v465_v1 = vld [vmem:[%s4488_s1 + $0xb8] sm:$0xff]  ;;  %520 = vmatprep.subr.mxu0 %v2532_v0  ;;  %v464_v3 = vld [vmem:[%s4488_s1 + $0xb0] sm:$0xff]  ;;  %v463_v5 = vld [vmem:[%s4488_s1 + $0xa8] sm:$0xff]  ;;  %v3109_v54 = vmov 0.0   ;;  %vm723_vm2 = vcmask 1045504   ;;  %vm968_vm3 = vcmask 982016  }
  0x18   : > { %617 = vmatprep.subr.mxu1 %v465_v1  ;;  %521 = vmatpush1.msra.mxu0 %v2531_v2  ;;  %v2529_v6 = vld [vmem:[%s4488_s1 + $0x160] sm:$0xff]  ;;  %v2528_v8 = vld [vmem:[%s4488_s1 + $0x158] sm:$0xff]  ;;  %v2527_v10 = vld [vmem:[%s4488_s1 + $0x150] sm:$0xff]  ;;  %s2720_s23 = sshll.u32 %s3290_s15, 5  ;;  %vm1020_vm4 = vcmask 850944   ;;  %vm1118_vm5 = vcmask 236544  }
  0x19   : > { %618 = vmatpush1.msra.mxu1 %v464_v3  ;;  %v462_v7 = vld [vmem:[%s4488_s1 + $0xa0] sm:$0xff]  ;;  %522 = vmatprep.subr.mxu0 %v2530_v4  ;;  %v461_v9 = vld [vmem:[%s4488_s1 + $0x98] sm:$0xff]  ;;  %v460_v11 = vld [vmem:[%s4488_s1 + $0x90] sm:$0xff]  ;;  %s3338_s19 = scalar_lea.vmem %s4487_s0, %s2720_s23  ;;  %vm1125_vm6 = vcmask 1044480   ;;  %vm1635_vm7 = vcmask 916480   ;;  %vm1671_vm8 = vcmask 523264  }
  0x1a   : > { %619 = vmatprep.subr.mxu1 %v463_v5  ;;  %523 = vmatpush1.msra.mxu0 %v2529_v6  ;;  %v2526_v12 = vld [vmem:[%s4488_s1 + $0x148] sm:$0xff]  ;;  %v2525_v14 = vld [vmem:[%s4488_s1 + $0x140] sm:$0xff]  ;;  %v2524_v16 = vld [vmem:[%s4488_s1 + $0x138] sm:$0xff]  ;;  %vm3112_vm9 = vmmov 0   ;;  %vm1757_vm10 = vcmask 1043456   ;;  %vm1753_vm11 = vcmask 97280  }
  0x1b   : > { %620 = vmatpush1.msra.mxu1 %v462_v7  ;;  %v459_v13 = vld [vmem:[%s4488_s1 + $0x88] sm:$0xff]  ;;  %524 = vmatprep.subr.mxu0 %v2528_v8  ;;  %v458_v15 = vld [vmem:[%s4488_s1 + $0x80] sm:$0xff]  ;;  %v457_v17 = vld [vmem:[%s4488_s1 + $0x78] sm:$0xff]  ;;  %vm2359_vm12 = vcmask 261120   ;;  %s2717_s23 = sshll.u32 %s3205_s29, 4  ;;  %vm2433_vm13 = vcmask 73728  }
  0x1c   : > { %621 = vmatprep.subr.mxu1 %v461_v9  ;;  %525 = vmatpush1.msra.mxu0 %v2527_v10  ;;  %v2523_v18 = vld [vmem:[%s4488_s1 + $0x130] sm:$0xff]  ;;  %v2522_v20 = vld [vmem:[%s4488_s1 + $0x128] sm:$0xff]  ;;  %v2521_v22 = vld [vmem:[%s4488_s1 + $0x120] sm:$0xff]  ;;  %s4452_s16 = scalar_lea.hbm %s4500_s13, %s2717_s23  ;;  %s3113_s29 = smov [#allocation2]  }
  0x1d   : > { %622 = vmatpush1.msra.mxu1 %v460_v11  ;;  %526 = vmatprep.subr.mxu0 %v2526_v12  ;;  %v456_v19 = vld [vmem:[%s4488_s1 + $0x70] sm:$0xff]  ;;  %v455_v21 = vld [vmem:[%s4488_s1 + $0x68] sm:$0xff]  ;;  %v454_v23 = vld [vmem:[%s4488_s1 + $0x60] sm:$0xff] }
  0x1e   : > { %623 = vmatprep.subr.mxu1 %v459_v13  ;;  %527 = vmatpush1.msra.mxu0 %v2525_v14  ;;  %v2520_v24 = vld [vmem:[%s4488_s1 + $0x118] sm:$0xff]  ;;  %v2519_v26 = vld [vmem:[%s4488_s1 + $0x110] sm:$0xff]  ;;  %v2518_v28 = vld [vmem:[%s4488_s1 + $0x108] sm:$0xff] }
  0x1f   : > { %624 = vmatpush1.msra.mxu1 %v458_v15  ;;  %528 = vmatprep.subr.mxu0 %v2524_v16  ;;  %v453_v25 = vld [vmem:[%s4488_s1 + $0x58] sm:$0xff]  ;;  %v452_v27 = vld [vmem:[%s4488_s1 + $0x50] sm:$0xff]  ;;  %v451_v29 = vld [vmem:[%s4488_s1 + $0x48] sm:$0xff] }
  0x20   : > { %625 = vmatprep.subr.mxu1 %v457_v17  ;;  %529 = vmatpush1.msra.mxu0 %v2523_v18  ;;  %v2517_v30 = vld [vmem:[%s4488_s1 + $0x100] sm:$0xff]  ;;  %v2516_v32 = vld [vmem:[%s4488_s1 + $0xf8] sm:$0xff]  ;;  %v2515_v34 = vld [vmem:[%s4488_s1 + $0xf0] sm:$0xff] }
  0x21   : > { %626 = vmatpush1.msra.mxu1 %v456_v19  ;;  %530 = vmatprep.subr.mxu0 %v2522_v20  ;;  %v450_v31 = vld [vmem:[%s4488_s1 + $0x40] sm:$0xff]  ;;  %v449_v33 = vld [vmem:[%s4488_s1 + $0x38] sm:$0xff]  ;;  %v448_v35 = vld [vmem:[%s4488_s1 + $0x30] sm:$0xff] }
  0x22   : > { %627 = vmatprep.subr.mxu1 %v455_v21  ;;  %531 = vmatpush1.msra.mxu0 %v2521_v22  ;;  %v2514_v36 = vld [vmem:[%s4488_s1 + $0xe8] sm:$0xff]  ;;  %v3359_v38 = vld [vmem:[%s3338_s19] sm:$0xff]  ;;  %v2512_v42 = vld [vmem:[%s4488_s1 + $0xd8] sm:$0xff] }
  0x23   : > { %628 = vmatpush1.msra.mxu1 %v454_v23  ;;  %532 = vmatprep.subr.mxu0 %v2520_v24  ;;  %v447_v37 = vld [vmem:[%s4488_s1 + $0x28] sm:$0xff]  ;;  %v2513_v40 = vld [vmem:[%s4488_s1 + $0xe0] sm:$0xff]  ;;  %v445_v43 = vld [vmem:[%s4488_s1 + $0x18] sm:$0xff]  ;;  %v496_v46 = vrot.slane %v3359_v38, 1  ;;  %v724_v16 = vrot.slane %v3359_v38, 2 }
  0x24   : > { %629 = vmatprep.subr.mxu1 %v453_v25  ;;  %533 = vmatpush1.msra.mxu0 %v2519_v26  ;;  %v3362_v39 = vld [vmem:[%s3338_s19 + $0x8] sm:$0xff]  ;;  %v446_v41 = vld [vmem:[%s4488_s1 + $0x20] sm:$0xff]  ;;  %v2511_v44 = vld [vmem:[%s4488_s1 + $0xd0] sm:$0xff] }
  0x25   : > { %630 = vmatpush1.msra.mxu1 %v452_v27  ;;  %534 = vmatprep.subr.mxu0 %v2518_v28  ;;  %v444_v45 = vld [vmem:[%s4488_s1 + $0x10] sm:$0xff]  ;;  %v497_v47 = vrot.slane %v3362_v39, 1  ;;  %v2510_v48 = vld [vmem:[%s4488_s1 + $0xc8] sm:$0xff]  ;;  %v2509_v50 = vld [vmem:[%s4488_s1 + $0xc0] sm:$0xff]  ;;  %v725_v17 = vrot.slane %v3362_v39, 2 }
  0x26   : > { %631 = vmatprep.subr.mxu1 %v451_v29  ;;  %535 = vmatpush1.msra.mxu0 %v2517_v30  ;;  %v443_v49 = vld [vmem:[%s4488_s1 + $0x8] sm:$0xff]  ;;  %v3394_v51 = vld [vmem:[%s3338_s19 + $0x10] sm:$0xff]  ;;  %v442_v52 = vld [vmem:[%s4488_s1] sm:$0xff] }
  0x27   : > { %632 = vmatpush1.msra.mxu1 %v450_v31  ;;  %536 = vmatprep.subr.mxu0 %v2516_v32  ;;  %v498_v53 = vsel %vm495_vm0, %v496_v46, %v497_v47  ;;  %v2564_v55 = vld [vmem:[%s4488_s1 + $0x238] sm:$0xff]  ;;  %v499_v56 = vrot.slane %v3394_v51, 1  ;;  %v2563_v57 = vld [vmem:[%s4488_s1 + $0x230] sm:$0xff]  ;;  %v2562_v59 = vld [vmem:[%s4488_s1 + $0x228] sm:$0xff]  ;;  %v726_v22 = vsel %vm723_vm2, %v724_v16, %v725_v17  ;;  %v727_v23 = vrot.slane %v3394_v51, 2 }
  0x28   : > { %633 = vmatprep.subr.mxu1 %v449_v33  ;;  %537 = vmatpush1.msra.mxu0 %v2515_v34  ;;  %v3410_v58 = vld [vmem:[%s3338_s19 + $0x18] sm:$0xff]  ;;  %v2561_v60 = vld [vmem:[%s4488_s1 + $0x220] sm:$0xff]  ;;  %v2559_v0 = vld [vmem:[%s4488_s1 + $0x210] sm:$0xff] }
  0x29   : > { %634 = vmatpush1.msra.mxu1 %v448_v35  ;;  %538 = vmatprep.subr.mxu0 %v2514_v36  ;;  %v2560_v61 = vld [vmem:[%s4488_s1 + $0x218] sm:$0xff]  ;;  %v500_v62 = vsel %vm495_vm0, %v497_v47, %v499_v56  ;;  %v501_v63 = vrot.slane %v3410_v58, 1  ;;  %v2558_v1 = vld [vmem:[%s4488_s1 + $0x208] sm:$0xff]  ;;  %v2557_v2 = vld [vmem:[%s4488_s1 + $0x200] sm:$0xff]  ;;  %v728_v24 = vsel %vm723_vm2, %v725_v17, %v727_v23  ;;  %v729_v25 = vrot.slane %v3410_v58, 2 }
  0x2a   : > { %635 = vmatprep.subr.mxu1 %v447_v37  ;;  %539 = vmatpush1.msra.mxu0 %v2513_v40  ;;  %v2556_v3 = vld [vmem:[%s4488_s1 + $0x1f8] sm:$0xff]  ;;  %v2555_v5 = vld [vmem:[%s4488_s1 + $0x1f0] sm:$0xff]  ;;  %v2554_v6 = vld [vmem:[%s4488_s1 + $0x1e8] sm:$0xff] }
  0x2b   : > { %636 = vmatpush1.msra.mxu1 %v446_v41  ;;  %540 = vmatprep.subr.mxu0 %v2512_v42  ;;  %v502_v4 = vsel %vm495_vm0, %v499_v56, %v501_v63  ;;  %v2553_v7 = vld [vmem:[%s4488_s1 + $0x1e0] sm:$0xff]  ;;  %v2552_v8 = vld [vmem:[%s4488_s1 + $0x1d8] sm:$0xff]  ;;  %v2551_v9 = vld [vmem:[%s4488_s1 + $0x1d0] sm:$0xff]  ;;  %v730_v26 = vsel %vm723_vm2, %v727_v23, %v729_v25 }
  0x2c   : > { %637 = vmatprep.subr.mxu1 %v445_v43  ;;  %541 = vmatpush1.msra.mxu0 %v2511_v44  ;;  %v2550_v10 = vld [vmem:[%s4488_s1 + $0x1c8] sm:$0xff]  ;;  %v2549_v11 = vld [vmem:[%s4488_s1 + $0x1c0] sm:$0xff]  ;;  %v2548_v12 = vld [vmem:[%s4488_s1 + $0x1b8] sm:$0xff] }
  0x2d   : > { %638 = vmatpush1.msra.mxu1 %v444_v45  ;;  %542 = vmatprep.subr.mxu0 %v2510_v48  ;;  %v2547_v13 = vld [vmem:[%s4488_s1 + $0x1b0] sm:$0xff]  ;;  %v2546_v14 = vld [vmem:[%s4488_s1 + $0x1a8] sm:$0xff]  ;;  %v2545_v15 = vld [vmem:[%s4488_s1 + $0x1a0] sm:$0xff] }
  0x2e   : > { %639 = vmatprep.subr.mxu1 %v443_v49  ;;  %543 = vmatpush1.msra.mxu0 %v2509_v50  ;;  %v2544_v18 = vld [vmem:[%s4488_s1 + $0x198] sm:$0xff]  ;;  %v2543_v19 = vld [vmem:[%s4488_s1 + $0x190] sm:$0xff]  ;;  %v2542_v20 = vld [vmem:[%s4488_s1 + $0x188] sm:$0xff] }
  0x2f   : > { %576 = vmatprep.mubr.f32.mxu0 %v3109_v54  ;;  %640 = vmatpush1.msra.mxu1 %v442_v52  ;;  %v2541_v21 = vld [vmem:[%s4488_s1 + $0x180] sm:$0xff]  ;;  %v1006_v27 = vld [vmem:[%s4491_s4 + $0x78] sm:$0xff]  ;;  %v1005_v28 = vld [vmem:[%s4491_s4 + $0x70] sm:$0xff] }
  0x30   : > { %673 = vmatprep.mubr.f32.mxu1 %v3109_v54  ;;  %2533 = vmatmul.mubr.msk.f32.vlgmr.msra.gmra.mxu0 %vm503_vm1, %v498_v53  ;;  %v1004_v29 = vld [vmem:[%s4491_s4 + $0x68] sm:$0xff]  ;;  %v1003_v30 = vld [vmem:[%s4491_s4 + $0x60] sm:$0xff]  ;;  %v1002_v31 = vld [vmem:[%s4491_s4 + $0x58] sm:$0xff] }
  0x31   : > { %2537 = vmatmul.mubr.msk.f32.vlgmr.msra.gmra.mxu1 %vm503_vm1, %v3359_v38  ;;  %747 = vmatprep.subr.mxu0 %v2564_v55  ;;  %v1001_v32 = vld [vmem:[%s4491_s4 + $0x50] sm:$0xff]  ;;  %v1000_v33 = vld [vmem:[%s4491_s4 + $0x48] sm:$0xff]  ;;  %v999_v34 = vld [vmem:[%s4491_s4 + $0x40] sm:$0xff] }
  0x32   : > { %582 = vmatprep.mubr.f32.mxu0 %v3109_v54  ;;  %748 = vmatpush1.msra.mxu0 %v2563_v57  ;;  %v998_v35 = vld [vmem:[%s4491_s4 + $0x38] sm:$0xff]  ;;  %v997_v36 = vld [vmem:[%s4491_s4 + $0x30] sm:$0xff]  ;;  %v996_v37 = vld [vmem:[%s4491_s4 + $0x28] sm:$0xff] }
  0x33   : > { %679 = vmatprep.mubr.f32.mxu1 %v3109_v54  ;;  %749 = vmatprep.subr.mxu0 %v2562_v59  ;;  %v995_v38 = vld [vmem:[%s4491_s4 + $0x20] sm:$0xff]  ;;  %v993_v40 = vld [vmem:[%s4491_s4 + $0x10] sm:$0xff]  ;;  %v992_v41 = vld [vmem:[%s4491_s4 + $0x8] sm:$0xff] }
  0x34   : > { %1033 = vmatprep.subr.mxu1 %v3109_v54  ;;  %750 = vmatpush1.msra.mxu0 %v2561_v60  ;;  %v991_v42 = vld [vmem:[%s4491_s4] sm:$0xff]  ;;  %v1018_v44 = vld [vmem:[%s4491_s4 + $0xd8] sm:$0xff]  ;;  %v1017_v45 = vld [vmem:[%s4491_s4 + $0xd0] sm:$0xff]  ;;  %v838_v60 = vlaneseq }
  0x35   : > { %2538 = vmatmul.mubr.msk.f32.gmra.mxu1 %vm503_vm1, %v3362_v39  ;;  %751 = vmatprep.subr.mxu0 %v2560_v61  ;;  %v994_v39 = vld [vmem:[%s4491_s4 + $0x18] sm:$0xff]  ;;  %v1019_v43 = vld [vmem:[%s4491_s4 + $0xe0] sm:$0xff]  ;;  %v1016_v46 = vld [vmem:[%s4491_s4 + $0xc8] sm:$0xff] }
  0x36   : > { %2534 = vmatmul.mubr.msk.f32.gmra.mxu0 %vm503_vm1, %v500_v62  ;;  %685 = vmatprep.mubr.f32.mxu1 %v3109_v54  ;;  %v1015_v47 = vld [vmem:[%s4491_s4 + $0xc0] sm:$0xff]  ;;  %v1014_v48 = vld [vmem:[%s4491_s4 + $0xb8] sm:$0xff]  ;;  %v1013_v49 = vld [vmem:[%s4491_s4 + $0xb0] sm:$0xff] }
  0x37   : > { %752 = vmatpush1.msra.mxu0 %v2559_v0  ;;  %588 = vmatprep.mubr.f32.mxu0 %v3109_v54  ;;  %v1012_v50 = vld [vmem:[%s4491_s4 + $0xa8] sm:$0xff] }
  0x38   : > { %753 = vmatprep.subr.mxu0 %v2558_v1  ;;  %1034 = vmatpush1.msra.mxu1 %v1006_v27 }
  0x39   : > { %754 = vmatpush1.msra.mxu0 %v2557_v2  ;;  %2539 = vmatmul.mubr.msk.f32.gmra.mxu1 %vm503_vm1, %v3394_v51  ;;  %v1011_v51 = vld [vmem:[%s4491_s4 + $0xa0] sm:$0xff] }
  0x3a   : > { %755 = vmatprep.subr.mxu0 %v2556_v3  ;;  %2535 = vmatmul.mubr.msk.f32.gmra.mxu0 %vm503_vm1, %v502_v4  ;;  %v836_v3 = vld [vmem:[%s4489_s2] ss:$4 sm:$0x3] }
  0x3b   : > { %756 = vmatpush1.msra.mxu0 %v2555_v5  ;;  %594 = vmatprep.mubr.f32.mxu0 %v3109_v54 }
  0x3c   : > { %757 = vmatprep.subr.mxu0 %v2554_v6  ;;  %691 = vmatprep.mubr.f32.mxu1 %v3109_v54 }
  0x3d   : > { %758 = vmatpush1.msra.mxu0 %v2553_v7  ;;  %2540 = vmatmul.mubr.msk.f32.gmra.mxu1 %vm503_vm1, %v3410_v58 }
  0x3e   : > { %759 = vmatprep.subr.mxu0 %v2552_v8  ;;  %2536 = vmatmul.mubr.msk.f32.gmra.mxu0 %vm503_vm1, %v501_v63  ;;  %v839_v63 = vshrl.u32 %v838_v60, 7  ;;  %v1007_v60 = vld [vmem:[%s4491_s4 + $0x80] sm:$0xff] }
  0x3f   : > { %760 = vmatpush1.msra.mxu0 %v2551_v9  ;;  %803 = vmatprep.mubr.f32.mxu0 %v3109_v54 }
  0x40   : > { %761 = vmatprep.subr.mxu0 %v2550_v10  ;;  %1035 = vmatprep.subr.mxu1 %v3109_v54  ;;  %v3615_v2 = vsub.s32 0, %v839_v63  ;;  %v3620_v5 = vsub.s32 1, %v839_v63 }
  0x41   : > { %762 = vmatpush1.msra.mxu0 %v2549_v11  ;;  %1036 = vmatpush1.msra.mxu1 %v1005_v28 }
  0x42   : > { %763 = vmatprep.subr.mxu0 %v2548_v12  ;;  %1037 = vmatprep.subr.mxu1 %v3109_v54  ;;  %v3623_v8 = vrot.slane %v836_v3, %v3615_v2 }
  0x43   : > { %764 = vmatpush1.msra.mxu0 %v2547_v13  ;;  %1038 = vmatpush1.msra.mxu1 %v1004_v29  ;;  %v2569_v13 = vld [vmem:[%s4489_s2 + $0x1] ss:$4 sm:$0x3] }
  0x44   : > { %765 = vmatprep.subr.mxu0 %v2546_v14  ;;  %1039 = vmatprep.subr.mxu1 %v3109_v54  ;;  %v3629_v14 = vrot.slane %v836_v3, %v3620_v5  ;;  %v3640_v27 = vrot.slane %v2569_v13, %v3620_v5 }
  0x45   : > { %766 = vmatpush1.msra.mxu0 %v2545_v15  ;;  %1040 = vmatpush1.msra.mxu1 %v1003_v30 }
  0x46   : > { %767 = vmatprep.subr.mxu0 %v2544_v18  ;;  %1041 = vmatprep.subr.mxu1 %v3109_v54 }
  0x47   : > { %768 = vmatpush1.msra.mxu0 %v2543_v19  ;;  %1042 = vmatpush1.msra.mxu1 %v1002_v31  ;;  %v3633_v19 = vrot.slane %v2569_v13, %v3615_v2 }
  0x48   : > { %769 = vmatprep.subr.mxu0 %v2542_v20  ;;  %1043 = vmatprep.subr.mxu1 %v3109_v54 }
  0x49   : > { %770 = vmatpush1.msra.mxu0 %v2541_v21  ;;  %1044 = vmatpush1.msra.mxu1 %v1001_v32 }
  0x4a   : > { %2565 = vmatmul.mubr.msk.f32.vlgmr.msra.gmra.mxu0 %vm503_vm1, %v726_v22  ;;  %1045 = vmatprep.subr.mxu1 %v3109_v54 }
  0x4b   : > { %809 = vmatprep.mubr.f32.mxu0 %v3109_v54  ;;  %1046 = vmatpush1.msra.mxu1 %v1000_v33  ;;  %v1010_v33 = vld [vmem:[%s4491_s4 + $0x98] sm:$0xff] }
  0x4c   : > { %1047 = vmatprep.subr.mxu1 %v3109_v54 }
  0x4d   : > { %1048 = vmatpush1.msra.mxu1 %v999_v34  ;;  %v1009_v34 = vld [vmem:[%s4491_s4 + $0x90] sm:$0xff] }
  0x4e   : > { %2566 = vmatmul.mubr.msk.f32.gmra.mxu0 %vm503_vm1, %v728_v24  ;;  %1049 = vmatprep.subr.mxu1 %v3109_v54 }
  0x4f   : > { %815 = vmatprep.mubr.f32.mxu0 %v3109_v54  ;;  %1050 = vmatpush1.msra.mxu1 %v998_v35 }
  0x50   : > { %1051 = vmatprep.subr.mxu1 %v3109_v54 }
  0x51   : > { %1052 = vmatpush1.msra.mxu1 %v997_v36 }
  0x52   : > { %2567 = vmatmul.mubr.msk.f32.gmra.mxu0 %vm503_vm1, %v730_v26  ;;  %1053 = vmatprep.subr.mxu1 %v3109_v54  ;;  %v2570_v26 = vld [vmem:[%s4489_s2 + $0x2] ss:$4 sm:$0x3] }
  0x53   : > { %821 = vmatprep.mubr.f32.mxu0 %v3109_v54  ;;  %1054 = vmatpush1.msra.mxu1 %v996_v37  ;;  %v891_v36 = vrot.slane %v2570_v26, %v3615_v2 }
  0x54   : > { %1055 = vmatprep.subr.mxu1 %v3109_v54 }
  0x55   : > { %1056 = vmatpush1.msra.mxu1 %v995_v38 }
  0x56   : > { %2568 = vmatmul.mubr.msk.f32.gmra.mxu0 %vm503_vm1, %v729_v25  ;;  %1057 = vmatprep.subr.mxu1 %v3109_v54 }
  0x57   : > { %1058 = vmatpush1.msra.mxu1 %v994_v39 }
  0x58   : > { %1059 = vmatprep.subr.mxu1 %v3109_v54 }
  0x59   : > { %1060 = vmatpush1.msra.mxu1 %v993_v40 }
  0x5a   : > { %1061 = vmatprep.subr.mxu1 %v3109_v54 }
  0x5b   : > { %1062 = vmatpush1.msra.mxu1 %v992_v41 }
  0x5c   : > { %1063 = vmatprep.subr.mxu1 %v3109_v54 }
  0x5d   : > { %1064 = vmatpush1.msra.mxu1 %v991_v42 }
  0x5e   : > { %1071 = vmatprep.subr.mxu1 %v3109_v54 }
  0x5f   : > { %1072 = vmatpush2.msra.mxu1 %v1019_v43 }
  0x60   : > { %1073 = vmatprep.subr.mxu1 %v3109_v54 }
  0x61   : > { %1074 = vmatpush2.msra.mxu1 %v1018_v44  ;;  %v895_v44 = vrot.slane %v2570_v26, %v3620_v5 }
  0x62   : > { %1075 = vmatprep.subr.mxu1 %v3109_v54 }
  0x63   : > { %1076 = vmatpush2.msra.mxu1 %v1017_v45 }
  0x64   : > { %1077 = vmatprep.subr.mxu1 %v3109_v54 }
  0x65   : > { %1078 = vmatpush2.msra.mxu1 %v1016_v46 }
  0x66   : > { %1079 = vmatprep.subr.mxu1 %v3109_v54 }
  0x67   : > { %1080 = vmatpush2.msra.mxu1 %v1015_v47 }
  0x68   : > { %1081 = vmatprep.subr.mxu1 %v3109_v54 }
  0x69   : > { %1082 = vmatpush2.msra.mxu1 %v1014_v48 }
  0x6a   : > { %1083 = vmatprep.subr.mxu1 %v3109_v54 }
  0x6b   : > { %1084 = vmatpush2.msra.mxu1 %v1013_v49 }
  0x6c   : > { %1085 = vmatprep.subr.mxu1 %v3109_v54 }
  0x6d   : > { %1086 = vmatpush2.msra.mxu1 %v1012_v50  ;;  %v1008_v50 = vld [vmem:[%s4491_s4 + $0x88] sm:$0xff] }
  0x6e   : > { %1087 = vmatprep.subr.mxu1 %v3109_v54 }
  0x6f   : > { %1088 = vmatpush2.msra.mxu1 %v1011_v51 }
  0x70   : > { %1089 = vmatprep.subr.mxu1 %v3109_v54 }
  0x71   : > { %1090 = vmatpush2.msra.mxu1 %v1010_v33 }
  0x72   : > { %1091 = vmatprep.subr.mxu1 %v3109_v54 }
  0x73   : > { %1092 = vmatpush2.msra.mxu1 %v1009_v34 }
  0x74   : > { %1093 = vmatprep.subr.mxu1 %v3109_v54 }
  0x75   : > { %1094 = vmatpush2.msra.mxu1 %v1008_v50 }
  0x76   : > { %1095 = vmatprep.subr.mxu1 %v3109_v54 }
  0x77   : > { %1096 = vmatpush2.msra.mxu1 %v1007_v60  ;;  %v989_v60 = vld [vmem:[%s4490_s3] sm:$0xff] }
  0x78   : > { %2821 = vmatprep.mubr.msk.f32.mxu0 %vm1118_vm5, %v989_v60  ;;  %v2583_v60 = vld [vmem:[%s4492_s5 + $0x118] sm:$0xff] }
  0xf0   : > { %v578_v52 = vpop.f32.mrf.mxu0 }
  0xf1   : > { %v675_v57 = vpop.f32.mrf.mxu1 }
  0xf2   : > { %v580_v53 = vpop.f32.mrf.mxu0  ;;  %v676_v7 = vadd.f32 %v675_v57, %v578_v52 }
  0xf3   : > { %v677_v59 = vpop.f32.mrf.mxu1 }
  0xf4   : > { %v678_v10 = vadd.f32 %v677_v59, %v580_v53 }
  0xf5   : > { %v681_v61 = vpop.f32.mrf.mxu1 }
  0xf6   : > { %v584_v55 = vpop.f32.mrf.mxu0 }
  0xf7   : > { %v683_v0 = vpop.f32.mrf.mxu1  ;;  %v682_v16 = vadd.f32 %v681_v61, %v584_v55 }
  0xf8   : > { %v586_v56 = vpop.f32.mrf.mxu0 }
  0xf9   : > { %v687_v4 = vpop.f32.mrf.mxu1  ;;  %v684_v21 = vadd.f32 %v683_v0, %v586_v56 }
  0xfa   : > { %v590_v58 = vpop.f32.mrf.mxu0 }
  0xfb   : > { %v689_v11 = vpop.f32.mrf.mxu1  ;;  %v688_v29 = vadd.f32 %v687_v4, %v590_v58 }
  0xfc   : > { %v592_v62 = vpop.f32.mrf.mxu0 }
  0xfd   : > { %v693_v22 = vpop.f32.mrf.mxu1  ;;  %v690_v38 = vadd.f32 %v689_v11, %v592_v62 }
  0xfe   : > { %v596_v1 = vpop.f32.mrf.mxu0 }
  0xff   : > { %v695_v39 = vpop.f32.mrf.mxu1  ;;  %v694_v51 = vadd.f32 %v693_v22, %v596_v1 }
 0x100   : > { %v598_v6 = vpop.f32.mrf.mxu0 }
 0x101   : > { %v696_v52 = vadd.f32 %v695_v39, %v598_v6 }
 0x10a   : > { %v805_v9 = vpop.f32.mrf.mxu0 }
 0x10b   : > { %v828_v12 = vadd.f32 %v805_v9, %v676_v7 }
 0x10c   : > { %v807_v15 = vpop.f32.mrf.mxu0 }
 0x10d   : > { %v848_v17 = vadd.f32 %v3623_v8, %v828_v12  ;;  %v829_v18 = vadd.f32 %v807_v15, %v678_v10 }
 0x10e   : > { %v811_v20 = vpop.f32.mrf.mxu0 }
 0x10f   : > { %v856_v23 = vmax.f32 %v848_v17, 0.0  ;;  %v849_v24 = vadd.f32 %v3629_v14, %v829_v18  ;;  %v830_v25 = vadd.f32 %v811_v20, %v682_v16 }
 0x110   : > { %v813_v28 = vpop.f32.mrf.mxu0 }
 0x111   : > { %v857_v30 = vmax.f32 %v849_v24, 0.0  ;;  %v850_v31 = vadd.f32 %v3623_v8, %v830_v25  ;;  %v831_v32 = vadd.f32 %v813_v28, %v684_v21  ;;  %v877_v35 = vmul.f32 %v3633_v19, %v856_v23 }
 0x112   : > { %v817_v37 = vpop.f32.mrf.mxu0 }
 0x113   : > { %v858_v40 = vmax.f32 %v850_v31, 0.0  ;;  %v851_v41 = vadd.f32 %v3629_v14, %v831_v32  ;;  %v832_v42 = vadd.f32 %v817_v37, %v688_v29  ;;  %v878_v43 = vmul.f32 %v3640_v27, %v857_v30 }
 0x114   : > { %v819_v45 = vpop.f32.mrf.mxu0  ;;  %v898_v55 = vadd.f32 %v891_v36, %v877_v35 }
 0x115   : > { %v879_v46 = vmul.f32 %v3633_v19, %v858_v40  ;;  %v859_v47 = vmax.f32 %v851_v41, 0.0  ;;  %v852_v48 = vadd.f32 %v3623_v8, %v832_v42  ;;  %v833_v49 = vadd.f32 %v819_v45, %v690_v38 }
 0x116   : > { %v823_v53 = vpop.f32.mrf.mxu0  ;;  %v899_v63 = vadd.f32 %v895_v44, %v878_v43  ;;  %v914_v7 = vrot.slane %v898_v55, 1 }
 0x117   : > { %v900_v56 = vadd.f32 %v891_v36, %v879_v46  ;;  %v880_v57 = vmul.f32 %v3640_v27, %v859_v47  ;;  %v860_v58 = vmax.f32 %v852_v48, 0.0  ;;  %v853_v59 = vadd.f32 %v3629_v14, %v833_v49 }
 0x118   : > { %v834_v61 = vadd.f32 %v823_v53, %v694_v51  ;;  %v825_v62 = vpop.f32.mrf.mxu0  ;;  %v917_v17 = vrot.slane %v899_v63, 1 }
 0x119   : > { %v901_v0 = vadd.f32 %v895_v44, %v880_v57  ;;  %v881_v1 = vmul.f32 %v3633_v19, %v860_v58  ;;  %v861_v3 = vmax.f32 %v853_v59, 0.0  ;;  %v835_v4 = vadd.f32 %v825_v62, %v696_v52  ;;  %v1232_v62 = vld [vmem:[%s4492_s5 + $0xe0] sm:$0xff] }
 0x11a   : > { %v854_v6 = vadd.f32 %v3623_v8, %v834_v61  ;;  %v915_v9 = vrot.slane %v900_v56, 1  ;;  %v1233_v61 = vld [vmem:[%s4492_s5 + $0xe8] sm:$0xff] }
 0x11b   : > { %v918_v10 = vrot.slane %v901_v0, 1  ;;  %v902_v11 = vadd.f32 %v891_v36, %v881_v1  ;;  %v882_v12 = vmul.f32 %v3640_v27, %v861_v3  ;;  %v855_v13 = vadd.f32 %v3629_v14, %v835_v4  ;;  %1357 = vmatprep.subr.mxu1 %v1233_v61  ;;  %v1229_v1 = vld [vmem:[%s4492_s5 + $0xc8] sm:$0xff]  ;;  %v1228_v3 = vld [vmem:[%s4492_s5 + $0xc0] sm:$0xff]  ;;  %v1227_v4 = vld [vmem:[%s4492_s5 + $0xb8] sm:$0xff] }
 0x11c   : > { %v862_v15 = vmax.f32 %v854_v6, 0.0  ;;  %v916_v16 = vsel %vm495_vm0, %v914_v7, %v915_v9  ;;  %v1226_v6 = vld [vmem:[%s4492_s5 + $0xb0] sm:$0xff]  ;;  %v1225_v7 = vld [vmem:[%s4492_s5 + $0xa8] sm:$0xff] }
 0x11d   : > { %v903_v18 = vadd.f32 %v895_v44, %v882_v12  ;;  %v863_v20 = vmax.f32 %v855_v13, 0.0  ;;  %v936_v21 = vmax.f32 %v898_v55, %v916_v16  ;;  %v919_v23 = vsel %vm495_vm0, %v917_v17, %v918_v10  ;;  %v1221_v12 = vld [vmem:[%s4492_s5 + $0x88] sm:$0xff]  ;;  %v1220_v13 = vld [vmem:[%s4492_s5 + $0x80] sm:$0xff]  ;;  %v1218_v16 = vld [vmem:[%s4492_s5 + $0x70] sm:$0xff] }
 0x11e   : > { %v883_v22 = vmul.f32 %v3633_v19, %v862_v15  ;;  %v920_v8 = vrot.slane %v902_v11, 1  ;;  %v937_v29 = vmax.f32 %v899_v63, %v919_v23  ;;  %v1231_v63 = vld [vmem:[%s4492_s5 + $0xd8] sm:$0xff]  ;;  %v1217_v17 = vld [vmem:[%s4492_s5 + $0x68] sm:$0xff]  ;;  %v1212_v23 = vld [vmem:[%s4492_s5 + $0x40] sm:$0xff] }
 0x11f   : > { %v922_v24 = vrot.slane %v903_v18, 1  ;;  %v884_v25 = vmul.f32 %v3640_v27, %v863_v20  ;;  %952 = vrot.lane.b32.xlu0 %v936_v21, %s3110_s21  ;;  %v1219_v15 = vld [vmem:[%s4492_s5 + $0x78] sm:$0xff]  ;;  %v2582_v61 = vld [vmem:[%s4492_s5 + $0x110] sm:$0xff] }
 0x120   : > { %v904_v26 = vadd.f32 %v891_v36, %v883_v22  ;;  %v921_v14 = vsel %vm495_vm0, %v915_v9, %v920_v8  ;;  %v1224_v9 = vld [vmem:[%s4492_s5 + $0xa0] sm:$0xff]  ;;  %v1215_v20 = vld [vmem:[%s4492_s5 + $0x58] sm:$0xff]  ;;  %v1213_v22 = vld [vmem:[%s4492_s5 + $0x48] sm:$0xff] }
 0x121   : > { %v905_v28 = vadd.f32 %v895_v44, %v884_v25  ;;  %v938_v30 = vmax.f32 %v900_v56, %v921_v14  ;;  %v923_v32 = vsel %vm495_vm0, %v918_v10, %v922_v24  ;;  %v1223_v10 = vld [vmem:[%s4492_s5 + $0x98] sm:$0xff]  ;;  %v1209_v25 = vld [vmem:[%s4492_s5 + $0x28] sm:$0xff] }
 0x122   : > { %v924_v31 = vrot.slane %v904_v26, 1  ;;  %v939_v34 = vmax.f32 %v901_v0, %v923_v32  ;;  %v1230_v0 = vld [vmem:[%s4492_s5 + $0xd0] sm:$0xff]  ;;  %v1207_v14 = vld [vmem:[%s4492_s5 + $0x18] sm:$0xff] }
 0x123   : > { %v926_v33 = vrot.slane %v905_v28, 1  ;;  %954 = vrot.lane.b32.xlu0 %v937_v29, %s3110_s21  ;;  %956 = vrot.lane.b32.xlu1 %v938_v30, %s3110_s21 }
 0x124   : > { %v925_v19 = vsel %vm495_vm0, %v920_v8, %v924_v31  ;;  %v942_v36 = vmax.f32 %v904_v26, %v924_v31  ;;  %v1211_v8 = vld [vmem:[%s4492_s5 + $0x38] sm:$0xff]  ;;  %v1208_v26 = vld [vmem:[%s4492_s5 + $0x20] sm:$0xff] }
 0x125   : > { %v940_v35 = vmax.f32 %v902_v11, %v925_v19  ;;  %v927_v27 = vsel %vm495_vm0, %v922_v24, %v926_v33  ;;  %v943_v38 = vmax.f32 %v905_v28, %v926_v33  ;;  %v1222_v11 = vld [vmem:[%s4492_s5 + $0x90] sm:$0xff] }
 0x126   : > { %v941_v37 = vmax.f32 %v903_v18, %v927_v27  ;;  %v1216_v18 = vld [vmem:[%s4492_s5 + $0x60] sm:$0xff]  ;;  %v1210_v24 = vld [vmem:[%s4492_s5 + $0x30] sm:$0xff]  ;;  %v2607_v27 = vld [vmem:[%s4492_s5 + $0x1d8] sm:$0xff] }
 0x127   : > { %958 = vrot.lane.b32.xlu1 %v939_v34, %s3110_s21  ;;  %960 = vrot.lane.b32.xlu0 %v940_v35, %s3110_s21 }
 0x12b   : > { %964 = vrot.lane.b32.xlu0 %v942_v36, %s3110_s21  ;;  %962 = vrot.lane.b32.xlu1 %v941_v37, %s3110_s21 }
 0x12f   : > { %966 = vrot.lane.b32.xlu1 %v943_v38, %s3110_s21  ;;  %s431_s21 = sand.u32 1, %s3099_s26  }
 0x130   : > { %s432_s24 = scalar_lea.vmem [#allocation2], %s431_s21  ;;  %s2436_s27 = scalar_lea.sflag [#allocation3], %s431_s21 }
 0x131   : > { %s2448_s19 = sshll.u32 %s432_s24, 4  ;;  %s2449_s19 = int_to_ptr.vmem [resolvable:$true] %s2448_s19 }
 0x132   : > { %s3047_s17 = scalar_lea.vmem %s2449_s19, 16 }
 0x133   : > { %p3048_p11 = scmp.ne.s32.totalorder %s2449_s19, %s3047_s17 }
 0x135   : > { %p3049_p12 = pnand %p3048_p11, %p3222_p5 }
 0x137   : > { %p3050_p13 = pneg %p3049_p12 }
 0x191   : > { %v953_v39 = vpop.permute.xlu0 %952 }
 0x195   : > { %v955_v40 = vpop.permute.xlu0 %954  ;;  %v957_v41 = vpop.permute.xlu1 %956 }
 0x196   : > { %v969_v42 = vsel %vm968_vm3, %v953_v39, %v955_v40  ;;  %v982_v43 = vmax.f32 %v937_v29, %v955_v40  ;;  %v2603_v39 = vld [vmem:[%s4492_s5 + $0x1b8] sm:$0xff]  ;;  %v2602_v40 = vld [vmem:[%s4492_s5 + $0x1b0] sm:$0xff] }
 0x197   : > { %v981_v44 = vmax.f32 %v936_v21, %v969_v42  ;;  %v1214_v21 = vld [vmem:[%s4492_s5 + $0x50] sm:$0xff]  ;;  %v2600_v42 = vld [vmem:[%s4492_s5 + $0x1a0] sm:$0xff] }
 0x198   : > { %2571 = vmatprep.mubr.msk.f32.mxu1 %vm1020_vm4, %v982_v43  ;;  %v2599_v43 = vld [vmem:[%s4492_s5 + $0x198] sm:$0xff] }
 0x199   : > { %1098 = vmatmul.mubr.f32.vlgmr.msra.gmra.mxu1 %v981_v44  ;;  %v959_v45 = vpop.permute.xlu1 %958  ;;  %v961_v49 = vpop.permute.xlu0 %960  ;;  %v2598_v44 = vld [vmem:[%s4492_s5 + $0x190] sm:$0xff] }
 0x19a   : > { %v970_v46 = vsel %vm968_vm3, %v957_v41, %v959_v45  ;;  %v984_v47 = vmax.f32 %v939_v34, %v959_v45  ;;  %1358 = vmatpush1.msra.mxu1 %v1232_v62  ;;  %v2601_v41 = vld [vmem:[%s4492_s5 + $0x1a8] sm:$0xff]  ;;  %v1206_v62 = vld [vmem:[%s4492_s5 + $0x10] sm:$0xff] }
 0x19b   : > { %v983_v48 = vmax.f32 %v938_v30, %v970_v46  ;;  %1359 = vmatprep.subr.mxu1 %v1231_v63  ;;  %v2597_v45 = vld [vmem:[%s4492_s5 + $0x188] sm:$0xff]  ;;  %v2596_v46 = vld [vmem:[%s4492_s5 + $0x180] sm:$0xff] }
 0x19c   : > { %2572 = vmatprep.mubr.msk.f32.mxu1 %vm1020_vm4, %v984_v47  ;;  %1360 = vmatpush1.msra.mxu1 %v1230_v0  ;;  %v2595_v47 = vld [vmem:[%s4492_s5 + $0x178] sm:$0xff]  ;;  %v2581_v63 = vld [vmem:[%s4492_s5 + $0x108] sm:$0xff] }
 0x19d   : > { %1103 = vmatmul.mubr.f32.gmra.mxu1 %v983_v48  ;;  %v963_v50 = vpop.permute.xlu1 %962  ;;  %v965_v55 = vpop.permute.xlu0 %964  ;;  %1361 = vmatprep.subr.mxu1 %v1229_v1  ;;  %v2594_v48 = vld [vmem:[%s4492_s5 + $0x170] sm:$0xff]  ;;  %v1205_v0 = vld [vmem:[%s4492_s5 + $0x8] sm:$0xff]  ;;  %v2580_v1 = vld [vmem:[%s4492_s5 + $0x100] sm:$0xff] }
 0x19e   : > { %v971_v51 = vsel %vm968_vm3, %v961_v49, %v963_v50  ;;  %v986_v52 = vmax.f32 %v941_v37, %v963_v50  ;;  %1362 = vmatpush1.msra.mxu1 %v1228_v3  ;;  %v2605_v37 = vld [vmem:[%s4492_s5 + $0x1c8] sm:$0xff]  ;;  %v2592_v50 = vld [vmem:[%s4492_s5 + $0x160] sm:$0xff] }
 0x19f   : > { %v985_v53 = vmax.f32 %v940_v35, %v971_v51  ;;  %1363 = vmatprep.subr.mxu1 %v1227_v4  ;;  %v990_v35 = vld [vmem:[%s4490_s3 + $0x8] sm:$0x7f]  ;;  %v2591_v51 = vld [vmem:[%s4492_s5 + $0x158] sm:$0xff]  ;;  %v1204_v3 = vld [vmem:[%s4492_s5] sm:$0xff] }
 0x1a0   : > { %2573 = vmatprep.mubr.msk.f32.mxu1 %vm1020_vm4, %v986_v52  ;;  %1364 = vmatpush1.msra.mxu1 %v1226_v6  ;;  %v2593_v49 = vld [vmem:[%s4492_s5 + $0x168] sm:$0xff]  ;;  %v2590_v52 = vld [vmem:[%s4492_s5 + $0x150] sm:$0xff]  ;;  %v2579_v4 = vld [vmem:[%s4492_s5 + $0xf8] sm:$0xff] }
 0x1a1   : > { %1108 = vmatmul.mubr.f32.gmra.mxu1 %v985_v53  ;;  %v967_v56 = vpop.permute.xlu1 %966  ;;  %1365 = vmatprep.subr.mxu1 %v1225_v7  ;;  %v2589_v53 = vld [vmem:[%s4492_s5 + $0x148] sm:$0xff]  ;;  %v2578_v6 = vld [vmem:[%s4492_s5 + $0xf0] sm:$0xff] }
 0x1a2   : > { %v972_v57 = vsel %vm968_vm3, %v965_v55, %v967_v56  ;;  %v988_v58 = vmax.f32 %v943_v38, %v967_v56  ;;  %1366 = vmatpush1.msra.mxu1 %v1224_v9  ;;  %v2604_v38 = vld [vmem:[%s4492_s5 + $0x1c0] sm:$0xff]  ;;  %v2587_v56 = vld [vmem:[%s4492_s5 + $0x138] sm:$0xff]  ;;  %v2641_v7 = vld [vmem:[%s4492_s5 + $0x2c8] sm:$0xff] }
 0x1a3   : > { %v987_v59 = vmax.f32 %v942_v36, %v972_v57  ;;  %1367 = vmatprep.subr.mxu1 %v1223_v10  ;;  %v2606_v36 = vld [vmem:[%s4492_s5 + $0x1d0] sm:$0xff]  ;;  %v2588_v55 = vld [vmem:[%s4492_s5 + $0x140] sm:$0xff] }
 0x1a4   : > { %2574 = vmatprep.mubr.msk.f32.mxu1 %vm1020_vm4, %v988_v58  ;;  %1368 = vmatpush1.msra.mxu1 %v1222_v11  ;;  %v2586_v57 = vld [vmem:[%s4492_s5 + $0x130] sm:$0xff]  ;;  %v2585_v58 = vld [vmem:[%s4492_s5 + $0x128] sm:$0xff] }
 0x1a5   : > { %1113 = vmatmul.mubr.f32.gmra.mxu1 %v987_v59  ;;  %1369 = vmatprep.subr.mxu1 %v1221_v12  ;;  %v2584_v59 = vld [vmem:[%s4492_s5 + $0x120] sm:$0xff] }
 0x1a6   : > { %1419 = vmatprep.mubr.f32.mxu1 %v3109_v54  ;;  %1370 = vmatpush1.msra.mxu1 %v1220_v13  ;;  %v2640_v13 = vld [vmem:[%s4492_s5 + $0x2c0] sm:$0xff] }
 0x1a7   : > { %1371 = vmatprep.subr.mxu1 %v1219_v15 }
 0x1a8   : > { %1372 = vmatpush1.msra.mxu1 %v1218_v16  ;;  %v2639_v16 = vld [vmem:[%s4492_s5 + $0x2b8] sm:$0xff] }
 0x1a9   : > { %1373 = vmatprep.subr.mxu1 %v1217_v17  ;;  %v2638_v17 = vld [vmem:[%s4492_s5 + $0x2b0] sm:$0xff] }
 0x1aa   : > { %1374 = vmatpush1.msra.mxu1 %v1216_v18  ;;  %v2637_v18 = vld [vmem:[%s4492_s5 + $0x2a8] sm:$0xff] }
 0x1ab   : > { %1375 = vmatprep.subr.mxu1 %v1215_v20  ;;  %v2636_v20 = vld [vmem:[%s4492_s5 + $0x2a0] sm:$0xff] }
 0x1ac   : > { %1376 = vmatpush1.msra.mxu1 %v1214_v21  ;;  %v2635_v21 = vld [vmem:[%s4492_s5 + $0x298] sm:$0xff] }
 0x1ad   : > { %1377 = vmatprep.subr.mxu1 %v1213_v22  ;;  %v2634_v22 = vld [vmem:[%s4492_s5 + $0x290] sm:$0xff] }
 0x1ae   : > { %1378 = vmatpush1.msra.mxu1 %v1212_v23  ;;  %v2633_v23 = vld [vmem:[%s4492_s5 + $0x288] sm:$0xff] }
 0x1af   : > { %1379 = vmatprep.subr.mxu1 %v1211_v8  ;;  %v2632_v8 = vld [vmem:[%s4492_s5 + $0x280] sm:$0xff] }
 0x1b0   : > { %1380 = vmatpush1.msra.mxu1 %v1210_v24  ;;  %v2631_v24 = vld [vmem:[%s4492_s5 + $0x278] sm:$0xff] }
 0x1b1   : > { %1381 = vmatprep.subr.mxu1 %v1209_v25  ;;  %v2630_v25 = vld [vmem:[%s4492_s5 + $0x270] sm:$0xff] }
 0x1b2   : > { %1382 = vmatpush1.msra.mxu1 %v1208_v26  ;;  %v2629_v26 = vld [vmem:[%s4492_s5 + $0x268] sm:$0xff] }
 0x1b3   : > { %1383 = vmatprep.subr.mxu1 %v1207_v14  ;;  %v2628_v14 = vld [vmem:[%s4492_s5 + $0x260] sm:$0xff] }
 0x1b4   : > { %1384 = vmatpush1.msra.mxu1 %v1206_v62  ;;  %v1670_v62 = vld [vmem:[%s4495_s8 + $0xb8] sm:$0xff] }
 0x1b5   : > { %1385 = vmatprep.subr.mxu1 %v1205_v0  ;;  %v1668_v0 = vld [vmem:[%s4495_s8 + $0xa8] sm:$0xff] }
 0x1b6   : > { %1386 = vmatpush1.msra.mxu1 %v1204_v3  ;;  %v1666_v3 = vld [vmem:[%s4495_s8 + $0x98] sm:$0xff] }
 0x1b7   : > { %1678 = vmatprep.subr.mxu1 %v3109_v54 }
 0x259   : > { %v1099_v28 = vpop.f32.mrf.mxu1 }
 0x25b   : > { %v1101_v29 = vpop.f32.mrf.mxu1 }
 0x25c   : > { %v2626_v29 = vld [vmem:[%s4492_s5 + $0x250] sm:$0xff] }
 0x25d   : > { %v1104_v30 = vpop.f32.mrf.mxu1 }
 0x25f   : > { %v1106_v31 = vpop.f32.mrf.mxu1 }
 0x260   : > { %v2624_v31 = vld [vmem:[%s4492_s5 + $0x240] sm:$0xff] }
 0x261   : > { %v1109_v32 = vpop.f32.mrf.mxu1 }
 0x263   : > { %v1111_v33 = vpop.f32.mrf.mxu1 }
 0x264   : > { %v2622_v33 = vld [vmem:[%s4492_s5 + $0x230] sm:$0xff] }
 0x265   : > { %v1114_v19 = vpop.f32.mrf.mxu1 }
 0x266   : > { %2813 = vmatprep.subr.msk.mxu0 %vm1125_vm6, %v1114_v19 }
 0x267   : > { %v1116_v34 = vpop.f32.mrf.mxu1  ;;  %2814 = vmatpush3.msk.msra.mxu0 %vm1125_vm6, %v1114_v19  ;;  %v2621_v19 = vld [vmem:[%s4492_s5 + $0x228] sm:$0xff] }
 0x268   : > { %2815 = vmatprep.subr.mxu0 %v1109_v32  ;;  %v2620_v34 = vld [vmem:[%s4492_s5 + $0x220] sm:$0xff] }
 0x269   : > { %2816 = vmatpush3.msra.mxu0 %v1109_v32  ;;  %v2623_v32 = vld [vmem:[%s4492_s5 + $0x238] sm:$0xff] }
 0x26a   : > { %2817 = vmatprep.subr.mxu0 %v1104_v30 }
 0x26b   : > { %2818 = vmatpush3.msra.mxu0 %v1104_v30  ;;  %v2625_v30 = vld [vmem:[%s4492_s5 + $0x248] sm:$0xff] }
 0x26c   : > { %2819 = vmatprep.subr.mxu0 %v1099_v28 }
 0x26d   : > { %2820 = vmatpush3.msra.mxu0 %v1099_v28  ;;  %v2627_v28 = vld [vmem:[%s4492_s5 + $0x258] sm:$0xff] }
 0x26e   : > { %2822 = vmatmul.mubr.msk.f32.vlgmr.msra.gmra.mxu0 %vm1118_vm5, %v990_v35  ;;  %1276 = vmatprep.subr.mxu0 %v2607_v27  ;;  %v2619_v35 = vld [vmem:[%s4492_s5 + $0x218] sm:$0xff]  ;;  %v2618_v27 = vld [vmem:[%s4492_s5 + $0x210] sm:$0xff] }
 0x26f   : > { %1277 = vmatpush1.msra.mxu0 %v2606_v36  ;;  %1338 = vmatprep.mubr.f32.mxu0 %v3109_v54  ;;  %v2617_v36 = vld [vmem:[%s4492_s5 + $0x208] sm:$0xff] }
 0x270   : > { %1278 = vmatprep.subr.mxu0 %v2605_v37  ;;  %v2616_v37 = vld [vmem:[%s4492_s5 + $0x200] sm:$0xff] }
 0x271   : > { %1279 = vmatpush1.msra.mxu0 %v2604_v38  ;;  %v2615_v38 = vld [vmem:[%s4492_s5 + $0x1f8] sm:$0xff] }
 0x272   : > { %1280 = vmatprep.subr.mxu0 %v2603_v39  ;;  %v2614_v39 = vld [vmem:[%s4492_s5 + $0x1f0] sm:$0xff] }
 0x273   : > { %1281 = vmatpush1.msra.mxu0 %v2602_v40 }
 0x274   : > { %1282 = vmatprep.subr.mxu0 %v2601_v41  ;;  %v2613_v41 = vld [vmem:[%s4492_s5 + $0x1e8] sm:$0xff] }
 0x275   : > { %1283 = vmatpush1.msra.mxu0 %v2600_v42  ;;  %v2612_v42 = vld [vmem:[%s4492_s5 + $0x1e0] sm:$0xff] }
 0x276   : > { %1284 = vmatprep.subr.mxu0 %v2599_v43 }
 0x277   : > { %1285 = vmatpush1.msra.mxu0 %v2598_v44 }
 0x278   : > { %1286 = vmatprep.subr.mxu0 %v2597_v45  ;;  %v1662_v45 = vld [vmem:[%s4495_s8 + $0x78] sm:$0xff] }
 0x279   : > { %1287 = vmatpush1.msra.mxu0 %v2596_v46  ;;  %v1661_v46 = vld [vmem:[%s4495_s8 + $0x70] sm:$0xff] }
 0x27a   : > { %1288 = vmatprep.subr.mxu0 %v2595_v47  ;;  %v1660_v47 = vld [vmem:[%s4495_s8 + $0x68] sm:$0xff] }
 0x27b   : > { %1289 = vmatpush1.msra.mxu0 %v2594_v48  ;;  %v1659_v48 = vld [vmem:[%s4495_s8 + $0x60] sm:$0xff] }
 0x27c   : > { %1290 = vmatprep.subr.mxu0 %v2593_v49  ;;  %v1658_v49 = vld [vmem:[%s4495_s8 + $0x58] sm:$0xff] }
 0x27d   : > { %1291 = vmatpush1.msra.mxu0 %v2592_v50  ;;  %v1657_v50 = vld [vmem:[%s4495_s8 + $0x50] sm:$0xff] }
 0x27e   : > { %1292 = vmatprep.subr.mxu0 %v2591_v51  ;;  %v1656_v51 = vld [vmem:[%s4495_s8 + $0x48] sm:$0xff] }
 0x27f   : > { %1293 = vmatpush1.msra.mxu0 %v2590_v52  ;;  %v1655_v52 = vld [vmem:[%s4495_s8 + $0x40] sm:$0xff] }
 0x280   : > { %1294 = vmatprep.subr.mxu0 %v2589_v53  ;;  %v1654_v53 = vld [vmem:[%s4495_s8 + $0x38] sm:$0xff] }
 0x281   : > { %1295 = vmatpush1.msra.mxu0 %v2588_v55  ;;  %v1653_v55 = vld [vmem:[%s4495_s8 + $0x30] sm:$0xff] }
 0x282   : > { %1296 = vmatprep.subr.mxu0 %v2587_v56  ;;  %v1652_v56 = vld [vmem:[%s4495_s8 + $0x28] sm:$0xff] }
 0x283   : > { %1297 = vmatpush1.msra.mxu0 %v2586_v57  ;;  %v1651_v57 = vld [vmem:[%s4495_s8 + $0x20] sm:$0xff] }
 0x284   : > { %1298 = vmatprep.subr.mxu0 %v2585_v58  ;;  %v1650_v58 = vld [vmem:[%s4495_s8 + $0x18] sm:$0xff] }
 0x285   : > { %1299 = vmatpush1.msra.mxu0 %v2584_v59  ;;  %v1649_v59 = vld [vmem:[%s4495_s8 + $0x10] sm:$0xff] }
 0x286   : > { %1300 = vmatprep.subr.mxu0 %v2583_v60  ;;  %v1648_v60 = vld [vmem:[%s4495_s8 + $0x8] sm:$0xff] }
 0x287   : > { %1301 = vmatpush1.msra.mxu0 %v2582_v61  ;;  %v1647_v61 = vld [vmem:[%s4495_s8] sm:$0xff] }
 0x288   : > { %1302 = vmatprep.subr.mxu0 %v2581_v63  ;;  %v1669_v63 = vld [vmem:[%s4495_s8 + $0xb0] sm:$0xff] }
 0x289   : > { %1303 = vmatpush1.msra.mxu0 %v2580_v1  ;;  %v1667_v1 = vld [vmem:[%s4495_s8 + $0xa0] sm:$0xff] }
 0x28a   : > { %1304 = vmatprep.subr.mxu0 %v2579_v4 }
 0x28b   : > { %1305 = vmatpush1.msra.mxu0 %v2578_v6 }
 0x28c   : > { %1472 = vmatprep.subr.mxu0 %v2641_v7 }
 0x32e   : > { %v3881_v9 = vpop.f32.mrf.mxu0 }
 0x32f   : > { %v1268_v11 = vrot.slane %v3881_v9, 1  ;;  %v1464_v43 = vrot.slane %v3881_v9, 2 }
 0x330   : > { %v3883_v10 = vpop.f32.mrf.mxu0 }
 0x331   : > { %v1267_v12 = vrot.slane %v3883_v10, 1  ;;  %2610 = vmatmul.mubr.msk.f32.vlgmr.msra.gmra.mxu1 %vm968_vm3, %v3883_v10  ;;  %v1463_v40 = vrot.slane %v3883_v10, 2 }
 0x332   : > { %1425 = vmatprep.mubr.f32.mxu1 %v3109_v54  ;;  %1679 = vmatpush1.msra.mxu1 %v1662_v45 }
 0x333   : > { %v1269_v15 = vsel %vm495_vm0, %v1267_v12, %v1268_v11  ;;  %v1465_v44 = vsel %vm723_vm2, %v1463_v40, %v1464_v43  ;;  %1680 = vmatprep.subr.mxu1 %v3109_v54  ;;  %v1664_v40 = vld [vmem:[%s4495_s8 + $0x88] sm:$0xff] }
 0x334   : > { %2608 = vmatmul.mubr.msk.f32.vlgmr.msra.gmra.mxu0 %vm968_vm3, %v1269_v15  ;;  %1681 = vmatpush1.msra.mxu1 %v1661_v46 }
 0x335   : > { %1473 = vmatpush1.msra.mxu0 %v2640_v13  ;;  %2611 = vmatmul.mubr.msk.f32.gmra.mxu1 %vm968_vm3, %v3881_v9 }
 0x336   : > { %1474 = vmatprep.subr.mxu0 %v2639_v16  ;;  %1344 = vmatprep.mubr.f32.mxu0 %v3109_v54 }
 0x337   : > { %1475 = vmatpush1.msra.mxu0 %v2638_v17  ;;  %1682 = vmatprep.subr.mxu1 %v3109_v54 }
 0x338   : > { %1476 = vmatprep.subr.mxu0 %v2637_v18  ;;  %2609 = vmatmul.mubr.msk.f32.gmra.mxu0 %vm968_vm3, %v1268_v11  ;;  %v1551_v11 = vld [vmem:[%s4493_s6] ss:$4 sm:$0x3]  ;;  %v2644_v18 = vld [vmem:[%s4493_s6 + $0x1] ss:$4 sm:$0x3] }
 0x339   : > { %1477 = vmatpush1.msra.mxu0 %v2636_v20  ;;  %1534 = vmatprep.mubr.f32.mxu0 %v3109_v54  ;;  %v1556_v15 = vrot.slane %v1551_v11, %v3615_v2 }
 0x33a   : > { %1478 = vmatprep.subr.mxu0 %v2635_v21  ;;  %1683 = vmatpush1.msra.mxu1 %v1660_v47 }
 0x33b   : > { %1479 = vmatpush1.msra.mxu0 %v2634_v22  ;;  %1684 = vmatprep.subr.mxu1 %v3109_v54  ;;  %v1560_v22 = vrot.slane %v1551_v11, %v3620_v5  ;;  %v1843_v11 = vld [vmem:[%s4496_s9 + $0x58] sm:$0xff] }
 0x33c   : > { %1480 = vmatprep.subr.mxu0 %v2633_v23  ;;  %1685 = vmatpush1.msra.mxu1 %v1659_v48 }
 0x33d   : > { %1481 = vmatpush1.msra.mxu0 %v2632_v8  ;;  %1686 = vmatprep.subr.mxu1 %v3109_v54 }
 0x33e   : > { %1482 = vmatprep.subr.mxu0 %v2631_v24  ;;  %1687 = vmatpush1.msra.mxu1 %v1658_v49 }
 0x33f   : > { %1483 = vmatpush1.msra.mxu0 %v2630_v25  ;;  %1688 = vmatprep.subr.mxu1 %v3109_v54  ;;  %v1577_v25 = vrot.slane %v2644_v18, %v3615_v2 }
 0x340   : > { %1484 = vmatprep.subr.mxu0 %v2629_v26  ;;  %1689 = vmatpush1.msra.mxu1 %v1657_v50 }
 0x341   : > { %1485 = vmatpush1.msra.mxu0 %v2628_v14  ;;  %1690 = vmatprep.subr.mxu1 %v3109_v54  ;;  %v2645_v14 = vld [vmem:[%s4493_s6 + $0x2] ss:$4 sm:$0x3] }
 0x342   : > { %1486 = vmatprep.subr.mxu0 %v2627_v28  ;;  %1691 = vmatpush1.msra.mxu1 %v1656_v51 }
 0x343   : > { %1487 = vmatpush1.msra.mxu0 %v2626_v29  ;;  %1692 = vmatprep.subr.mxu1 %v3109_v54  ;;  %v1581_v29 = vrot.slane %v2644_v18, %v3620_v5  ;;  %v1837_v18 = vld [vmem:[%s4496_s9 + $0x28] sm:$0xff] }
 0x344   : > { %1488 = vmatprep.subr.mxu0 %v2625_v30  ;;  %1693 = vmatpush1.msra.mxu1 %v1655_v52 }
 0x345   : > { %1489 = vmatpush1.msra.mxu0 %v2624_v31  ;;  %1694 = vmatprep.subr.mxu1 %v3109_v54 }
 0x346   : > { %1490 = vmatprep.subr.mxu0 %v2623_v32  ;;  %1695 = vmatpush1.msra.mxu1 %v1654_v53 }
 0x347   : > { %1491 = vmatpush1.msra.mxu0 %v2622_v33  ;;  %1696 = vmatprep.subr.mxu1 %v3109_v54 }
 0x348   : > { %1492 = vmatprep.subr.mxu0 %v2621_v19  ;;  %1697 = vmatpush1.msra.mxu1 %v1653_v55 }
 0x349   : > { %1493 = vmatpush1.msra.mxu0 %v2620_v34  ;;  %1698 = vmatprep.subr.mxu1 %v3109_v54  ;;  %v1594_v34 = vrot.slane %v2645_v14, %v3615_v2  ;;  %v1598_v2 = vrot.slane %v2645_v14, %v3620_v5  ;;  %v1646_v14 = vld [vmem:[%s4494_s7] sm:$0x3f] }
 0x34a   : > { %1494 = vmatprep.subr.mxu0 %v2619_v35  ;;  %1699 = vmatpush1.msra.mxu1 %v1652_v56 }
 0x34b   : > { %1495 = vmatpush1.msra.mxu0 %v2618_v27  ;;  %1700 = vmatprep.subr.mxu1 %v3109_v54  ;;  %v1665_v27 = vld [vmem:[%s4495_s8 + $0x90] sm:$0xff] }
 0x34c   : > { %1496 = vmatprep.subr.mxu0 %v2617_v36  ;;  %1701 = vmatpush1.msra.mxu1 %v1651_v57 }
 0x34d   : > { %1497 = vmatpush1.msra.mxu0 %v2616_v37  ;;  %1702 = vmatprep.subr.mxu1 %v3109_v54 }
 0x34e   : > { %1498 = vmatprep.subr.mxu0 %v2615_v38  ;;  %1703 = vmatpush1.msra.mxu1 %v1650_v58 }
 0x34f   : > { %1499 = vmatpush1.msra.mxu0 %v2614_v39  ;;  %1704 = vmatprep.subr.mxu1 %v3109_v54 }
 0x350   : > { %1500 = vmatprep.subr.mxu0 %v2613_v41  ;;  %1705 = vmatpush1.msra.mxu1 %v1649_v59 }
 0x351   : > { %1501 = vmatpush1.msra.mxu0 %v2612_v42  ;;  %1706 = vmatprep.subr.mxu1 %v3109_v54 }
 0x352   : > { %2642 = vmatmul.mubr.msk.f32.vlgmr.msra.gmra.mxu0 %vm968_vm3, %v1465_v44  ;;  %2831 = vmatprep.subr.mxu0 %v3109_v54  ;;  %v1663_v44 = vld [vmem:[%s4495_s8 + $0x80] sm:$0xff] }
 0x353   : > { %1540 = vmatprep.mubr.f32.mxu0 %v3109_v54  ;;  %1707 = vmatpush1.msra.mxu1 %v1648_v60 }
 0x354   : > { %1708 = vmatprep.subr.mxu1 %v3109_v54  ;;  %2832 = vmatpush3.msra.mxu0 %v1843_v11  ;;  %v2683_v11 = vld [vmem:[%s4496_s9 + $0x150] sm:$0xff] }
 0x355   : > { %1709 = vmatpush1.msra.mxu1 %v1647_v61  ;;  %2833 = vmatprep.subr.mxu0 %v3109_v54 }
 0x356   : > { %2643 = vmatmul.mubr.msk.f32.gmra.mxu0 %vm968_vm3, %v1464_v43  ;;  %1726 = vmatprep.subr.mxu1 %v3109_v54 }
 0x357   : > { %1727 = vmatpush2.msra.mxu1 %v1670_v62  ;;  %2855 = vmatprep.mubr.msk.f32.mxu0 %vm3112_vm9, %v3109_v54 }
 0x358   : > { %1728 = vmatprep.subr.mxu1 %v3109_v54 }
 0x359   : > { %1729 = vmatpush2.msra.mxu1 %v1669_v63 }
 0x35a   : > { %1730 = vmatprep.subr.mxu1 %v3109_v54 }
 0x35b   : > { %1731 = vmatpush2.msra.mxu1 %v1668_v0 }
 0x35c   : > { %1732 = vmatprep.subr.mxu1 %v3109_v54 }
 0x35d   : > { %1733 = vmatpush2.msra.mxu1 %v1667_v1 }
 0x35e   : > { %1734 = vmatprep.subr.mxu1 %v3109_v54 }
 0x35f   : > { %1735 = vmatpush2.msra.mxu1 %v1666_v3 }
 0x360   : > { %1736 = vmatprep.subr.mxu1 %v3109_v54 }
 0x361   : > { %1737 = vmatpush2.msra.mxu1 %v1665_v27  ;;  %v2667_v27 = vld [vmem:[%s4496_s9 + $0xd8] sm:$0xff] }
 0x362   : > { %1738 = vmatprep.subr.mxu1 %v3109_v54 }
 0x363   : > { %1739 = vmatpush2.msra.mxu1 %v1664_v40 }
 0x364   : > { %1740 = vmatprep.subr.mxu1 %v3109_v54 }
 0x365   : > { %1741 = vmatpush2.msra.mxu1 %v1663_v44  ;;  %v2660_v44 = vld [vmem:[%s4496_s9 + $0xa8] sm:$0xff] }
 0x366   : > { %2824 = vmatprep.subr.mxu1 %v3109_v54 }
 0x3f1   : > { %v1421_v7 = vpop.f32.mrf.mxu1 }
 0x3f3   : > { %v1423_v10 = vpop.f32.mrf.mxu1 }
 0x3f4   : > { %v1340_v4 = vpop.f32.mrf.mxu0 }
 0x3f5   : > { %v1422_v13 = vadd.f32 %v1421_v7, %v1340_v4  ;;  %v1427_v16 = vpop.f32.mrf.mxu1 }
 0x3f6   : > { %v1342_v6 = vpop.f32.mrf.mxu0 }
 0x3f7   : > { %v1424_v20 = vadd.f32 %v1423_v10, %v1342_v6  ;;  %v1429_v28 = vpop.f32.mrf.mxu1 }
 0x3f8   : > { %v1346_v9 = vpop.f32.mrf.mxu0 }
 0x3f9   : > { %v1428_v8 = vadd.f32 %v1427_v16, %v1346_v9  ;;  %v1839_v16 = vld [vmem:[%s4496_s9 + $0x38] sm:$0xff] }
 0x3fa   : > { %v1348_v12 = vpop.f32.mrf.mxu0 }
 0x3fb   : > { %v1430_v31 = vadd.f32 %v1429_v28, %v1348_v12  ;;  %v1842_v12 = vld [vmem:[%s4496_s9 + $0x50] sm:$0xff] }
 0x3fc   : > { %2834 = vmatpush3.msra.mxu0 %v1842_v12  ;;  %v2682_v12 = vld [vmem:[%s4496_s9 + $0x148] sm:$0xff] }
 0x3fd   : > { %2835 = vmatprep.subr.mxu0 %v3109_v54 }
 0x412   : > { %v1536_v17 = vpop.f32.mrf.mxu0 }
 0x413   : > { %v1547_v21 = vadd.f32 %v1536_v17, %v1422_v13  ;;  %v1841_v13 = vld [vmem:[%s4496_s9 + $0x48] sm:$0xff]  ;;  %v1838_v17 = vld [vmem:[%s4496_s9 + $0x30] sm:$0xff] }
 0x414   : > { %v1538_v23 = vpop.f32.mrf.mxu0  ;;  %2836 = vmatpush3.msra.mxu0 %v1841_v13  ;;  %v2681_v13 = vld [vmem:[%s4496_s9 + $0x140] sm:$0xff] }
 0x415   : > { %v1563_v24 = vadd.f32 %v1556_v15, %v1547_v21  ;;  %v1548_v26 = vadd.f32 %v1538_v23, %v1424_v20  ;;  %2837 = vmatprep.subr.mxu0 %v3109_v54  ;;  %v1836_v20 = vld [vmem:[%s4496_s9 + $0x20] sm:$0xff]  ;;  %v1835_v21 = vld [vmem:[%s4496_s9 + $0x18] sm:$0xff]  ;;  %v1833_v23 = vld [vmem:[%s4496_s9 + $0x8] sm:$0xff] }
 0x416   : > { %v1542_v30 = vpop.f32.mrf.mxu0 }
 0x417   : > { %v1567_v32 = vmax.f32 %v1563_v24, 0.0  ;;  %v1564_v33 = vadd.f32 %v1560_v22, %v1548_v26  ;;  %v1549_v19 = vadd.f32 %v1542_v30, %v1428_v8  ;;  %v1832_v8 = vld [vmem:[%s4496_s9] sm:$0xff]  ;;  %v2674_v30 = vld [vmem:[%s4496_s9 + $0x110] sm:$0xff] }
 0x418   : > { %v1544_v35 = vpop.f32.mrf.mxu0 }
 0x419   : > { %v1584_v36 = vmul.f32 %v1577_v25, %v1567_v32  ;;  %v1568_v37 = vmax.f32 %v1564_v33, 0.0  ;;  %v1565_v38 = vadd.f32 %v1556_v15, %v1549_v19  ;;  %v1550_v39 = vadd.f32 %v1544_v35, %v1430_v31  ;;  %v1840_v15 = vld [vmem:[%s4496_s9 + $0x40] sm:$0xff]  ;;  %v2673_v31 = vld [vmem:[%s4496_s9 + $0x108] sm:$0xff]  ;;  %v2671_v33 = vld [vmem:[%s4496_s9 + $0xf8] sm:$0xff] }
 0x41a   : > { %2838 = vmatpush3.msra.mxu0 %v1840_v15  ;;  %v2672_v32 = vld [vmem:[%s4496_s9 + $0x100] sm:$0xff]  ;;  %v2670_v19 = vld [vmem:[%s4496_s9 + $0xf0] sm:$0xff]  ;;  %v2680_v15 = vld [vmem:[%s4496_s9 + $0x138] sm:$0xff] }
 0x41b   : > { %v1585_v41 = vmul.f32 %v1581_v29, %v1568_v37  ;;  %v1569_v42 = vmax.f32 %v1565_v38, 0.0  ;;  %v1566_v43 = vadd.f32 %v1560_v22, %v1550_v39  ;;  %v1601_v47 = vadd.f32 %v1594_v34, %v1584_v36  ;;  %2839 = vmatprep.subr.mxu0 %v3109_v54  ;;  %v1834_v22 = vld [vmem:[%s4496_s9 + $0x10] sm:$0xff]  ;;  %v2668_v35 = vld [vmem:[%s4496_s9 + $0xe0] sm:$0xff]  ;;  %v2665_v37 = vld [vmem:[%s4496_s9 + $0xc8] sm:$0xff] }
 0x41c   : > { %2840 = vmatpush3.msra.mxu0 %v1839_v16  ;;  %v2666_v36 = vld [vmem:[%s4496_s9 + $0xd0] sm:$0xff]  ;;  %v2664_v38 = vld [vmem:[%s4496_s9 + $0xc0] sm:$0xff]  ;;  %v2662_v39 = vld [vmem:[%s4496_s9 + $0xb8] sm:$0xff] }
 0x41d   : > { %v1586_v45 = vmul.f32 %v1577_v25, %v1569_v42  ;;  %v1570_v46 = vmax.f32 %v1566_v43, 0.0  ;;  %v1602_v50 = vadd.f32 %v1598_v2, %v1585_v41  ;;  %v1609_v53 = vrot.slane %v1601_v47, 1  ;;  %2841 = vmatprep.subr.mxu0 %v3109_v54  ;;  %v2661_v42 = vld [vmem:[%s4496_s9 + $0xb0] sm:$0xff]  ;;  %v2701_v43 = vld [vmem:[%s4496_s9 + $0x1d8] sm:$0xff] }
 0x41e   : > { %2842 = vmatpush3.msra.mxu0 %v1838_v17  ;;  %v2679_v16 = vld [vmem:[%s4496_s9 + $0x130] sm:$0xff]  ;;  %v2678_v17 = vld [vmem:[%s4496_s9 + $0x128] sm:$0xff] }
 0x41f   : > { %v1603_v48 = vadd.f32 %v1594_v34, %v1586_v45  ;;  %v1587_v49 = vmul.f32 %v1581_v29, %v1570_v46  ;;  %v1612_v56 = vrot.slane %v1602_v50, 1  ;;  %2843 = vmatprep.subr.mxu0 %v3109_v54  ;;  %v2675_v29 = vld [vmem:[%s4496_s9 + $0x118] sm:$0xff]  ;;  %v2669_v34 = vld [vmem:[%s4496_s9 + $0xe8] sm:$0xff]  ;;  %v2700_v45 = vld [vmem:[%s4496_s9 + $0x1d0] sm:$0xff] }
 0x420   : > { %2844 = vmatpush3.msra.mxu0 %v1837_v18  ;;  %v2659_v46 = vld [vmem:[%s4496_s9 + $0xa0] sm:$0xff] }
 0x421   : > { %v1610_v51 = vrot.slane %v1603_v48, 1  ;;  %v1604_v52 = vadd.f32 %v1598_v2, %v1587_v49  ;;  %2845 = vmatprep.subr.mxu0 %v3109_v54  ;;  %v2698_v49 = vld [vmem:[%s4496_s9 + $0x1c0] sm:$0xff] }
 0x422   : > { %2846 = vmatpush3.msra.mxu0 %v1836_v20  ;;  %v2677_v18 = vld [vmem:[%s4496_s9 + $0x120] sm:$0xff] }
 0x423   : > { %v1613_v5 = vrot.slane %v1604_v52, 1  ;;  %v1611_v55 = vsel %vm495_vm0, %v1609_v53, %v1610_v51  ;;  %v1621_v60 = vmax.f32 %v1603_v48, %v1610_v51  ;;  %2847 = vmatprep.subr.mxu0 %v3109_v54  ;;  %v2658_v48 = vld [vmem:[%s4496_s9 + $0x98] sm:$0xff]  ;;  %v2696_v53 = vld [vmem:[%s4496_s9 + $0x1b0] sm:$0xff] }
 0x424   : > { %v1619_v57 = vmax.f32 %v1601_v47, %v1611_v55  ;;  %2848 = vmatpush3.msra.mxu0 %v1835_v21  ;;  %v2699_v47 = vld [vmem:[%s4496_s9 + $0x1c8] sm:$0xff]  ;;  %v2697_v51 = vld [vmem:[%s4496_s9 + $0x1b8] sm:$0xff] }
 0x425   : > { %v1614_v58 = vsel %vm495_vm0, %v1612_v56, %v1613_v5  ;;  %v1622_v61 = vmax.f32 %v1604_v52, %v1613_v5  ;;  %2849 = vmatprep.subr.mxu0 %v3109_v54  ;;  %v2656_v52 = vld [vmem:[%s4496_s9 + $0x88] sm:$0xff]  ;;  %v2655_v5 = vld [vmem:[%s4496_s9 + $0x80] sm:$0xff]  ;;  %v2654_v56 = vld [vmem:[%s4496_s9 + $0x78] sm:$0xff] }
 0x426   : > { %1627 = vrot.lane.b32.xlu0 %v1619_v57, %s3111_s20  ;;  %v1620_v59 = vmax.f32 %v1602_v50, %v1614_v58  ;;  %2850 = vmatpush3.msra.mxu0 %v1834_v22  ;;  %v2657_v50 = vld [vmem:[%s4496_s9 + $0x90] sm:$0xff]  ;;  %v2695_v55 = vld [vmem:[%s4496_s9 + $0x1a8] sm:$0xff]  ;;  %v2714_v21 = vld [vmem:[%s4496_s9 + $0x238] sm:$0xff] }
 0x427   : > { %2851 = vmatprep.subr.mxu0 %v3109_v54  ;;  %v2653_v58 = vld [vmem:[%s4496_s9 + $0x70] sm:$0xff] }
 0x428   : > { %1629 = vrot.lane.b32.xlu1 %v1620_v59, %s3111_s20  ;;  %2852 = vmatpush3.msra.mxu0 %v1833_v23  ;;  %v2713_v22 = vld [vmem:[%s4496_s9 + $0x230] sm:$0xff]  ;;  %v2712_v23 = vld [vmem:[%s4496_s9 + $0x228] sm:$0xff] }
 0x429   : > { %2853 = vmatprep.subr.mxu0 %v3109_v54 }
 0x42a   : > { %1631 = vrot.lane.b32.xlu0 %v1621_v60, %s3111_s20  ;;  %2854 = vmatpush3.msra.mxu0 %v1832_v8  ;;  %v2711_v8 = vld [vmem:[%s4496_s9 + $0x220] sm:$0xff] }
 0x42b   : > { %2858 = vmatprep.subr.mxu0 %v3109_v54 }
 0x42c   : > { %1633 = vrot.lane.b32.xlu1 %v1622_v61, %s3111_s20  ;;  %s3051_s20 = sshll.u32 %s3113_s29, 4  ;;  %s3052_s20 = int_to_ptr.vmem [resolvable:$false] %s3051_s20 }
 0x42d   : > { %s3053_s15 = scalar_lea.vmem %s3052_s20, 32  ;;  %p3054_p0 = scmp.lt.s32.totalorder %s2449_s19, %s3052_s20 }
 0x42e   : > { %p3055_p1 = scmp.lt.s32.totalorder %s3053_s15, %s3047_s17 }
 0x430   : > { %p3056_p2 = por %p3055_p1, %p3054_p0 }
 0x432   : > { %p3057_p3 = pnand %p3056_p2, %p3050_p13 }
 0x498   : > { %v1628_v62 = vpop.permute.xlu0 %1627 }
 0x49a   : > { %v1630_v63 = vpop.permute.xlu1 %1629 }
 0x49b   : > { %v1636_v0 = vsel %vm1635_vm7, %v1628_v62, %v1630_v63  ;;  %v1643_v1 = vmax.f32 %v1620_v59, %v1630_v63  ;;  %v2693_v59 = vld [vmem:[%s4496_s9 + $0x198] sm:$0xff]  ;;  %v2651_v62 = vld [vmem:[%s4496_s9 + $0x60] sm:$0xff]  ;;  %v2691_v63 = vld [vmem:[%s4496_s9 + $0x188] sm:$0xff] }
 0x49c   : > { %v1642_v3 = vmax.f32 %v1619_v57, %v1636_v0  ;;  %v1632_v4 = vpop.permute.xlu0 %1631  ;;  %v2694_v57 = vld [vmem:[%s4496_s9 + $0x1a0] sm:$0xff] }
 0x49d   : > { %2646 = vmatprep.mubr.msk.f32.mxu1 %vm1671_vm8, %v1643_v1  ;;  %v2688_v1 = vld [vmem:[%s4496_s9 + $0x178] sm:$0xff] }
 0x49e   : > { %v1634_v6 = vpop.permute.xlu1 %1633  ;;  %1743 = vmatmul.mubr.f32.vlgmr.msra.gmra.mxu1 %v1642_v3  ;;  %v2690_v3 = vld [vmem:[%s4496_s9 + $0x180] sm:$0xff] }
 0x49f   : > { %v1637_v7 = vsel %vm1635_vm7, %v1632_v4, %v1634_v6  ;;  %v1645_v9 = vmax.f32 %v1622_v61, %v1634_v6  ;;  %v2692_v61 = vld [vmem:[%s4496_s9 + $0x190] sm:$0xff] }
 0x4a0   : > { %v1644_v10 = vmax.f32 %v1621_v60, %v1637_v7  ;;  %v2652_v60 = vld [vmem:[%s4496_s9 + $0x68] sm:$0xff]  ;;  %v2687_v6 = vld [vmem:[%s4496_s9 + $0x170] sm:$0xff] }
 0x4a1   : > { %2647 = vmatprep.mubr.msk.f32.mxu1 %vm1671_vm8, %v1645_v9  ;;  %v2686_v7 = vld [vmem:[%s4496_s9 + $0x168] sm:$0xff]  ;;  %v2685_v9 = vld [vmem:[%s4496_s9 + $0x160] sm:$0xff] }
 0x4a2   : > { %1748 = vmatmul.mubr.f32.gmra.mxu1 %v1644_v10  ;;  %v2684_v10 = vld [vmem:[%s4496_s9 + $0x158] sm:$0xff] }
 0x4a3   : > { %2828 = vmatprep.mubr.msk.f32.mxu1 %vm3112_vm9, %v3109_v54 }
 0x55e   : > { %v1744_v24 = vpop.f32.mrf.mxu1 }
 0x560   : > { %v1746_v25 = vpop.f32.mrf.mxu1 }
 0x561   : > { %v2709_v25 = vld [vmem:[%s4496_s9 + $0x210] sm:$0xff] }
 0x562   : > { %v1749_v26 = vpop.f32.mrf.mxu1 }
 0x563   : > { %2825 = vmatpush3.msk.msra.mxu1 %vm1757_vm10, %v1749_v26  ;;  %v2708_v26 = vld [vmem:[%s4496_s9 + $0x208] sm:$0xff] }
 0x564   : > { %v1751_v28 = vpop.f32.mrf.mxu1  ;;  %2826 = vmatprep.subr.mxu1 %v3109_v54 }
 0x565   : > { %2827 = vmatpush3.msra.mxu1 %v1744_v24  ;;  %v2710_v24 = vld [vmem:[%s4496_s9 + $0x218] sm:$0xff] }
 0x566   : > { %2829 = vmatmul.mubr.msk.f32.vlgmr.msra.gmra.mxu1 %vm1753_vm11, %v1646_v14  ;;  %2885 = vmatprep.subr.mxu1 %v3109_v54  ;;  %v2707_v14 = vld [vmem:[%s4496_s9 + $0x200] sm:$0xff]  ;;  %v2706_v28 = vld [vmem:[%s4496_s9 + $0x1f8] sm:$0xff] }
 0x567   : > { %2886 = vmatpush3.msra.mxu1 %v2675_v29  ;;  %2909 = vmatprep.mubr.msk.f32.mxu1 %vm3112_vm9, %v3109_v54  ;;  %v2705_v29 = vld [vmem:[%s4496_s9 + $0x1f0] sm:$0xff] }
 0x568   : > { %2887 = vmatprep.subr.mxu1 %v3109_v54 }
 0x569   : > { %2888 = vmatpush3.msra.mxu1 %v2674_v30  ;;  %v2704_v30 = vld [vmem:[%s4496_s9 + $0x1e8] sm:$0xff] }
 0x56a   : > { %2889 = vmatprep.subr.mxu1 %v3109_v54 }
 0x56b   : > { %2890 = vmatpush3.msra.mxu1 %v2673_v31  ;;  %v2703_v31 = vld [vmem:[%s4496_s9 + $0x1e0] sm:$0xff] }
 0x56c   : > { %2891 = vmatprep.subr.mxu1 %v3109_v54 }
 0x56d   : > { %2892 = vmatpush3.msra.mxu1 %v2672_v32 }
 0x56e   : > { %2893 = vmatprep.subr.mxu1 %v3109_v54 }
 0x56f   : > { %2894 = vmatpush3.msra.mxu1 %v2671_v33  ;;  %v2357_v33 = vld [vmem:[%s4498_s11 + $0x18] sm:$0xff] }
 0x570   : > { %2895 = vmatprep.subr.mxu1 %v3109_v54 }
 0x571   : > { %2896 = vmatpush3.msra.mxu1 %v2670_v19  ;;  %v2356_v19 = vld [vmem:[%s4498_s11 + $0x10] sm:$0xff] }
 0x572   : > { %2897 = vmatprep.subr.mxu1 %v3109_v54 }
 0x573   : > { %2898 = vmatpush3.msra.mxu1 %v2669_v34  ;;  %v2355_v34 = vld [vmem:[%s4498_s11 + $0x8] sm:$0xff] }
 0x574   : > { %2899 = vmatprep.subr.mxu1 %v3109_v54 }
 0x575   : > { %2900 = vmatpush3.msra.mxu1 %v2668_v35  ;;  %v2354_v35 = vld [vmem:[%s4498_s11] sm:$0xff] }
 0x576   : > { %2901 = vmatprep.subr.mxu1 %v3109_v54 }
 0x577   : > { %2902 = vmatpush3.msra.mxu1 %v2667_v27 }
 0x578   : > { %2903 = vmatprep.subr.mxu1 %v3109_v54 }
 0x579   : > { %2904 = vmatpush3.msra.mxu1 %v2666_v36 }
 0x57a   : > { %2905 = vmatprep.subr.mxu1 %v3109_v54 }
 0x57b   : > { %2906 = vmatpush3.msra.mxu1 %v2665_v37 }
 0x57c   : > { %2907 = vmatprep.subr.mxu1 %v3109_v54 }
 0x57d   : > { %2908 = vmatpush3.msra.mxu1 %v2664_v38 }
 0x57e   : > { %2939 = vmatprep.subr.mxu1 %v3109_v54 }
 0x626   : > { %v4214_v40 = vpop.f32.mrf.mxu1 }
 0x627   : > { %v2018_v41 = vrot.slane %v4214_v40, 2  ;;  %2856 = vmatmul.mubr.msk.f32.vlgmr.msra.gmra.mxu0 %vm503_vm1, %v4214_v40  ;;  %v1931_v0 = vrot.slane %v4214_v40, 1  ;;  %v2192_v4 = vrot.slane %v4214_v40, 4  ;;  %v2105_v20 = vrot.slane %v4214_v40, 3 }
 0x628   : > { %2859 = vmatpush3.msra.mxu0 %v2662_v39  ;;  %v2830_v2 = vpop.f32.mrf.mxu1  ;;  %2882 = vmatprep.mubr.msk.f32.mxu0 %vm3112_vm9, %v3109_v54  ;;  %v2279_v32 = vrot.slane %v4214_v40, 5 }
 0x629   : > { %2860 = vmatprep.subr.mxu0 %v3109_v54  ;;  %2910 = vmatmul.mubr.msk.f32.vlgmr.msra.gmra.mxu1 %vm503_vm1, %v2018_v41 }
 0x62a   : > { %2861 = vmatpush3.msra.mxu0 %v2661_v42  ;;  %2940 = vmatpush3.msra.mxu1 %v2701_v43 }
 0x62b   : > { %2862 = vmatprep.subr.mxu0 %v3109_v54  ;;  %2941 = vmatprep.subr.mxu1 %v3109_v54 }
 0x62c   : > { %2863 = vmatpush3.msra.mxu0 %v2660_v44  ;;  %2942 = vmatpush3.msra.mxu1 %v2700_v45 }
 0x62d   : > { %2864 = vmatprep.subr.mxu0 %v3109_v54  ;;  %2943 = vmatprep.subr.mxu1 %v3109_v54 }
 0x62e   : > { %2865 = vmatpush3.msra.mxu0 %v2659_v46  ;;  %2944 = vmatpush3.msra.mxu1 %v2699_v47 }
 0x62f   : > { %2866 = vmatprep.subr.mxu0 %v3109_v54  ;;  %2945 = vmatprep.subr.mxu1 %v3109_v54 }
 0x630   : > { %2867 = vmatpush3.msra.mxu0 %v2658_v48  ;;  %2946 = vmatpush3.msra.mxu1 %v2698_v49 }
 0x631   : > { %2868 = vmatprep.subr.mxu0 %v3109_v54  ;;  %2947 = vmatprep.subr.mxu1 %v3109_v54 }
 0x632   : > { %2869 = vmatpush3.msra.mxu0 %v2657_v50  ;;  %2948 = vmatpush3.msra.mxu1 %v2697_v51 }
 0x633   : > { %2870 = vmatprep.subr.mxu0 %v3109_v54  ;;  %2949 = vmatprep.subr.mxu1 %v3109_v54 }
 0x634   : > { %2871 = vmatpush3.msra.mxu0 %v2656_v52  ;;  %2950 = vmatpush3.msra.mxu1 %v2696_v53  ;;  %v2358_v53 = vld [vmem:[%s4499_s12] sm:$0x1] }
 0x635   : > { %2872 = vmatprep.subr.mxu0 %v3109_v54  ;;  %2951 = vmatprep.subr.mxu1 %v3109_v54 }
 0x636   : > { %2873 = vmatpush3.msra.mxu0 %v2655_v5  ;;  %2952 = vmatpush3.msra.mxu1 %v2695_v55 }
 0x637   : > { %2874 = vmatprep.subr.mxu0 %v3109_v54  ;;  %2953 = vmatprep.subr.mxu1 %v3109_v54 }
 0x638   : > { %2875 = vmatpush3.msra.mxu0 %v2654_v56  ;;  %2954 = vmatpush3.msra.mxu1 %v2694_v57 }
 0x639   : > { %2876 = vmatprep.subr.mxu0 %v3109_v54  ;;  %2955 = vmatprep.subr.mxu1 %v3109_v54 }
 0x63a   : > { %2877 = vmatpush3.msra.mxu0 %v2653_v58  ;;  %2956 = vmatpush3.msra.mxu1 %v2693_v59 }
 0x63b   : > { %2878 = vmatprep.subr.mxu0 %v3109_v54  ;;  %2957 = vmatprep.subr.mxu1 %v3109_v54 }
 0x63c   : > { %2879 = vmatpush3.msra.mxu0 %v2652_v60  ;;  %2958 = vmatpush3.msra.mxu1 %v2692_v61 }
 0x63d   : > { %2880 = vmatprep.subr.mxu0 %v3109_v54  ;;  %2959 = vmatprep.subr.mxu1 %v3109_v54 }
 0x63e   : > { %2881 = vmatpush3.msra.mxu0 %v2651_v62  ;;  %2960 = vmatpush3.msra.mxu1 %v2691_v63 }
 0x63f   : > { %2883 = vmatmul.mubr.msk.f32.vlgmr.msra.gmra.mxu0 %vm503_vm1, %v1931_v0  ;;  %2912 = vmatprep.subr.mxu0 %v3109_v54 }
 0x640   : > { %2961 = vmatprep.subr.mxu1 %v3109_v54  ;;  %2913 = vmatpush3.msra.mxu0 %v2688_v1 }
 0x641   : > { %2962 = vmatpush3.msra.mxu1 %v2690_v3  ;;  %2963 = vmatprep.mubr.msk.f32.mxu1 %vm3112_vm9, %v3109_v54 }
 0x642   : > { %2914 = vmatprep.subr.mxu0 %v3109_v54  ;;  %2964 = vmatmul.mubr.msk.f32.vlgmr.msra.gmra.mxu1 %vm503_vm1, %v2192_v4 }
 0x643   : > { %2915 = vmatpush3.msra.mxu0 %v2687_v6  ;;  %2936 = vmatprep.mubr.msk.f32.mxu0 %vm3112_vm9, %v3109_v54 }
 0x644   : > { %2916 = vmatprep.subr.mxu0 %v3109_v54  ;;  %2993 = vmatprep.subr.mxu1 %v3109_v54 }
 0x645   : > { %2917 = vmatpush3.msra.mxu0 %v2686_v7  ;;  %3001 = vmatprep.mubr.msk.f32.mxu1 %vm3112_vm9, %v3109_v54 }
 0x646   : > { %2918 = vmatprep.subr.mxu0 %v3109_v54  ;;  %2994 = vmatpush3.msra.mxu1 %v2357_v33 }
 0x647   : > { %2919 = vmatpush3.msra.mxu0 %v2685_v9  ;;  %2995 = vmatprep.subr.mxu1 %v3109_v54 }
 0x648   : > { %2920 = vmatprep.subr.mxu0 %v3109_v54  ;;  %2996 = vmatpush3.msra.mxu1 %v2356_v19 }
 0x649   : > { %2921 = vmatpush3.msra.mxu0 %v2684_v10  ;;  %2997 = vmatprep.subr.mxu1 %v3109_v54 }
 0x64a   : > { %2922 = vmatprep.subr.mxu0 %v3109_v54  ;;  %2998 = vmatpush3.msra.mxu1 %v2355_v34 }
 0x64b   : > { %2923 = vmatpush3.msra.mxu0 %v2683_v11  ;;  %2999 = vmatprep.subr.mxu1 %v3109_v54 }
 0x64c   : > { %2924 = vmatprep.subr.mxu0 %v3109_v54  ;;  %3000 = vmatpush3.msra.mxu1 %v2354_v35 }
 0x64d   : > { %2925 = vmatpush3.msra.mxu0 %v2682_v12 }
 0x64e   : > { %2926 = vmatprep.subr.mxu0 %v3109_v54 }
 0x64f   : > { %2927 = vmatpush3.msra.mxu0 %v2681_v13 }
 0x650   : > { %2928 = vmatprep.subr.mxu0 %v3109_v54 }
 0x651   : > { %2929 = vmatpush3.msra.mxu0 %v2680_v15 }
 0x652   : > { %2930 = vmatprep.subr.mxu0 %v3109_v54 }
 0x653   : > { %2931 = vmatpush3.msra.mxu0 %v2679_v16 }
 0x654   : > { %2932 = vmatprep.subr.mxu0 %v3109_v54 }
 0x655   : > { %2933 = vmatpush3.msra.mxu0 %v2678_v17 }
 0x656   : > { %2934 = vmatprep.subr.mxu0 %v3109_v54 }
 0x657   : > { %2935 = vmatpush3.msra.mxu0 %v2677_v18 }
 0x658   : > { %2937 = vmatmul.mubr.msk.f32.vlgmr.msra.gmra.mxu0 %vm503_vm1, %v2105_v20  ;;  %2966 = vmatprep.subr.mxu0 %v3109_v54 }
 0x659   : > { %2967 = vmatpush3.msra.mxu0 %v2714_v21  ;;  %2990 = vmatprep.mubr.msk.f32.mxu0 %vm3112_vm9, %v3109_v54 }
 0x65a   : > { %2968 = vmatprep.subr.mxu0 %v3109_v54 }
 0x65b   : > { %2969 = vmatpush3.msra.mxu0 %v2713_v22 }
 0x65c   : > { %2970 = vmatprep.subr.mxu0 %v3109_v54 }
 0x65d   : > { %2971 = vmatpush3.msra.mxu0 %v2712_v23 }
 0x65e   : > { %2972 = vmatprep.subr.mxu0 %v3109_v54 }
 0x65f   : > { %2973 = vmatpush3.msra.mxu0 %v2711_v8 }
 0x660   : > { %2974 = vmatprep.subr.mxu0 %v3109_v54 }
 0x661   : > { %2975 = vmatpush3.msra.mxu0 %v2710_v24 }
 0x662   : > { %2976 = vmatprep.subr.mxu0 %v3109_v54 }
 0x663   : > { %2977 = vmatpush3.msra.mxu0 %v2709_v25 }
 0x664   : > { %2978 = vmatprep.subr.mxu0 %v3109_v54 }
 0x665   : > { %2979 = vmatpush3.msra.mxu0 %v2708_v26 }
 0x666   : > { %2980 = vmatprep.subr.mxu0 %v3109_v54 }
 0x667   : > { %2981 = vmatpush3.msra.mxu0 %v2707_v14 }
 0x668   : > { %2982 = vmatprep.subr.mxu0 %v3109_v54 }
 0x669   : > { %2983 = vmatpush3.msra.mxu0 %v2706_v28 }
 0x66a   : > { %2984 = vmatprep.subr.mxu0 %v3109_v54 }
 0x66b   : > { %2985 = vmatpush3.msra.mxu0 %v2705_v29 }
 0x66c   : > { %2986 = vmatprep.subr.mxu0 %v3109_v54 }
 0x66d   : > { %2987 = vmatpush3.msra.mxu0 %v2704_v30 }
 0x66e   : > { %2988 = vmatprep.subr.mxu0 %v3109_v54  ;;  %v1831_v54 = vld [vmem:[%s4497_s10] sm:$0x1] }
 0x66f   : > { %2989 = vmatpush3.msra.mxu0 %v2703_v31 }
 0x670   : > { %2991 = vmatmul.mubr.msk.f32.vlgmr.msra.gmra.mxu0 %vm503_vm1, %v2279_v32 }
 0x6e7   : > { %v1913_v27 = vpop.f32.mrf.mxu0 }
 0x6e8   : > { %v1917_v44 = vadd.f32 %v1913_v27, %v1831_v54 }
 0x6e9   : > { %v2857_v36 = vpop.f32.mrf.mxu0  ;;  %v2087_v37 = vpop.f32.mrf.mxu1 }
 0x6eb   : > { %v2911_v38 = vpop.f32.mrf.mxu1 }
 0x6ff   : > { %v2000_v39 = vpop.f32.mrf.mxu0 }
 0x700   : > { %v2004_v45 = vadd.f32 %v2000_v39, %v1917_v44 }
 0x701   : > { %v2884_v40 = vpop.f32.mrf.mxu0 }
 0x702   : > { %v2261_v41 = vpop.f32.mrf.mxu1  ;;  %v2091_v46 = vadd.f32 %v2087_v37, %v2004_v45 }
 0x704   : > { %v2965_v42 = vpop.f32.mrf.mxu1 }
 0x718   : > { %v2174_v43 = vpop.f32.mrf.mxu0 }
 0x719   : > { %v2178_v47 = vadd.f32 %v2174_v43, %v2091_v46 }
 0x71a   : > { %v2938_v2 = vpop.f32.mrf.mxu0 }
 0x71b   : > { %v2265_v48 = vadd.f32 %v2261_v41, %v2178_v47 }
 0x730   : > { %v2348_v49 = vpop.f32.mrf.mxu0 }
 0x731   : > { %v2352_v50 = vadd.f32 %v2348_v49, %v2265_v48 }
 0x732   : > { %v2992_v51 = vpop.f32.mrf.mxu0 }
 0x733   : > { %v2353_v52 = vmax.f32 %v2352_v50, 0.0 }
 0x735   : > { %3002 = vmatmul.mubr.msk.f32.vlgmr.msra.gmra.mxu1 %vm2359_vm12, %v2353_v52 }
 0x7f5   : > { %v2429_v5 = vpop.f32.mrf.mxu1 }
 0x7f6   : > { %v2430_v55 = vadd.f32 %v2429_v5, %v2358_v53 }
 0x7f7   : > { %v3003_v56 = vpop.f32.mrf.mxu1 }
 0x7f8   : > { %2434 = vst.msk [vmem:[%s432_s24] sm:$0x1] %vm2433_vm13, %v2430_v55 }
 0x7f9   : > { %3060 = shalt.err (!%p3057_p3)
}
 0x7fa   : > { %s3061_s22 = scalar_lea.hbm %s4452_s16, 16  ;;  %s3065_s24 = scalar_lea.hbm %s4500_s13, 32 }
 0x7fb   : > { %p3062_p4 = scmp.ne.s32.totalorder %s4452_s16, %s3061_s22  ;;  %p3066_p9 = scmp.lt.s32.totalorder %s4452_s16, %s4500_s13 }
 0x7fc   : > { %p3067_p10 = scmp.lt.s32.totalorder %s3065_s24, %s3061_s22 }
 0x7fd   : > { %p3063_p7 = pnand %p3062_p4, %p3222_p5 }
 0x7fe   : > { %p3068_p11 = por %p3067_p10, %p3066_p9 }
 0x7ff   : > { %p3064_p8 = pneg %p3063_p7 }
 0x801   : > { %p3069_p12 = pnand %p3068_p11, %p3064_p8 }
 0x803   : > { %3072 = shalt.err (!%p3069_p12)
}
 0x804   : > { %3004 = dma.vmem_to_hbm [thread:$0]  (%p3222_p5), %s2449_s19, 16, %s4452_s16, %s2436_s27  }
 0x805 PF: > { %p3010_p13 = scmp.ge.s32.totalorder %s3107_s28, 2  ;;  %s2460_s29 = sand.u32 1, %s3095_s25  }
 0x806   : > { %s2461_s20 = scalar_lea.sflag [#allocation3], %s2460_s29 }
 0x807   : > { %p3007_p0 = pnand %p3010_p13, %p3226_p6 }
 0x809   : > { %p3008_p1 = pneg %p3007_p0 }
 0x80b   : > { %3090 = dma.done.wait (%p3008_p1), %s2461_s20, 16  }
 0x80c   : > { %3092 = vsyncadd (%p3008_p1), %s2461_s20, 4294967280  ;;  %s4512_s28 = sld [smem:[#allocation6_spill]]  ;;  %s4515_s25 = smov %s3099_s26 }
 0x80d   : > { %s4513_s15 = sld [smem:[#allocation5_spill]] }
 0x80e   : > { %s4514_s27 = sld [smem:[#allocation7_spill]] }
 0x812   : > { %p23_p2 = scmp.ge.s32.totalorder %s4512_s28, 4  }
 0x813   : > { %s4516_s26 = smov %s4513_s15 }
 0x814   :  { %25 = sbr.rel (!%p23_p2) target bundleno = 3 (0x3), region = 120 }
 0x819   :  { %2465 = vsyncpa [#allocation3], 1 }
 0x81a   :  { %2467 = vsyncpa [#allocation3 + $0x1], 1 }

</bundles_post_ra>
